<compile_context>
chip_gen: v6e
topology: v6e:2x2x1
jax: 0.10.0
libtpu: 0.0.40
codegen_flags: <defaults>
</compile_context>

<pallas_src>
import functools

import jax
import jax.numpy as jnp
from jax.experimental import pallas as pl
from jax.experimental.pallas import tpu as pltpu


def _round_up(x: int, m: int) -> int:
    return ((x + m - 1) // m) * m


# -----------------------------------------------------------------------------
# Pallas kernel: fused actor-critic evaluate() for one batch tile
# -----------------------------------------------------------------------------
def actor_critic_kernel(
    x_ref,           # [TB, S+1] f32  (cols 0..S-1 = state, col S = action as f32)
    w1_ref, b1_ref,  # [S+1, Hp], [1, Hp]
    w2_ref, b2_ref,  # [Hp, Hp],  [1, Hp]
    w3_ref, b3_ref,  # [Hp, Op],  [1, Op]
    out_ref,         # [8, TB] f32  (row0=logprob, row1=value, row2=entropy)
    *,
    state_dim: int,
    action_dim: int,
):
    x = x_ref[...]                                             # [TB, S+1]

    # Fused actor+value MLP: 3 lane-aligned MXU matmuls serve both heads.
    h = jnp.tanh(jnp.dot(x, w1_ref[...], preferred_element_type=jnp.float32) + b1_ref[...])
    h = jnp.tanh(jnp.dot(h, w2_ref[...], preferred_element_type=jnp.float32) + b2_ref[...])
    y = jnp.dot(h, w3_ref[...], preferred_element_type=jnp.float32) + b3_ref[...]  # [TB, Op]

    tb, op = y.shape
    lane = jax.lax.broadcasted_iota(jnp.int32, (tb, op), 1)    # [TB, Op]
    is_logit = lane < action_dim

    # Stable masked softmax over the full 128-lane width (padded lanes -> -1e30,
    # which underflows to exactly 0 after exp; finite so e*z never produces NaN).
    neg = jnp.float32(-1e30)
    zl = jnp.where(is_logit, y, neg)
    m = jnp.max(zl, axis=-1, keepdims=True)                    # [TB, 1]
    z = zl - m
    e = jnp.exp(z)                                             # EUP
    s = jnp.sum(e, axis=-1, keepdims=True)                     # [TB, 1]
    log_s = jnp.log(s)
    recip_s = pl.reciprocal(s, approx=True)                    # EUP slot, ~free (approx)

    # Value head output sits at lane `action_dim`.
    value = y[:, action_dim:action_dim + 1]                    # [TB, 1]

    # Categorical.log_prob(action): in-kernel one-hot via iota; the action rides
    # in the last state column as an exact small float.
    act = x[:, state_dim:state_dim + 1].astype(jnp.int32)      # [TB, 1]
    logp = z - log_s
    logprob = jnp.sum(jnp.where(lane == act, logp, 0.0), axis=-1, keepdims=True)

    # Categorical.entropy(): -sum(p*logp) = log(s) - sum(e*z)/s (no probs materialized).
    entropy = log_s - jnp.sum(e * z, axis=-1, keepdims=True) * recip_s

    # Pack results into lanes 0..2 of a [TB, Op] slab, then move them to the
    # lane-dense transposed [8, TB] output with a tiny selector matmul
    # (contraction over the lane axis of both operands -> native MXU form).
    packed = (jnp.where(lane == 0, logprob, 0.0)
              + jnp.where(lane == 1, value, 0.0)
              + jnp.where(lane == 2, entropy, 0.0))            # [TB, Op]
    r8 = jax.lax.broadcasted_iota(jnp.int32, (8, op), 0)
    c8 = jax.lax.broadcasted_iota(jnp.int32, (8, op), 1)
    sel8 = (r8 == c8).astype(jnp.float32)                      # [8, Op] identity-ish
    out_ref[...] = jax.lax.dot_general(
        sel8, packed, (((1,), (1,)), ((), ())),
        preferred_element_type=jnp.float32)                    # [8, TB]


# -----------------------------------------------------------------------------
# One-time weight packing (hoisted out of the per-call path)
# -----------------------------------------------------------------------------
def pack_params(params):
    """Pack actor+value heads into one fused, lane-padded MLP.

    Hp = round_up(2H, 128), Op = round_up(A+1, 128), input width S+1 where the
    extra column carries the action and hits a zero row of W1.
      W1[:S, :H]=a_w1,  W1[:S, H:2H]=v_w1
      W2[:H, :H]=a_w2,  W2[H:2H, H:2H]=v_w2
      W3[:H, :A]=a_w3,  W3[H:2H, A]=v_w3  (value in lane A)
    """
    f32 = jnp.float32
    S = params["a_w1"].shape[0]
    H = params["a_w2"].shape[0]
    A = params["a_w3"].shape[1]
    Hp = max(128, _round_up(2 * H, 128))
    Op = max(128, _round_up(A + 1, 128))

    w1 = jnp.zeros((S + 1, Hp), f32)
    w1 = w1.at[:S, :H].set(params["a_w1"]).at[:S, H:2 * H].set(params["v_w1"])
    b1 = jnp.zeros((1, Hp), f32)
    b1 = b1.at[:, :H].set(params["a_b1"]).at[:, H:2 * H].set(params["v_b1"])

    w2 = jnp.zeros((Hp, Hp), f32)
    w2 = w2.at[:H, :H].set(params["a_w2"]).at[H:2 * H, H:2 * H].set(params["v_w2"])
    b2 = jnp.zeros((1, Hp), f32)
    b2 = b2.at[:, :H].set(params["a_b2"]).at[:, H:2 * H].set(params["v_b2"])

    w3 = jnp.zeros((Hp, Op), f32)
    w3 = w3.at[:H, :A].set(params["a_w3"]).at[H:2 * H, A:A + 1].set(params["v_w3"])
    b3 = jnp.zeros((1, Op), f32)
    b3 = b3.at[:, :A].set(params["a_b3"]).at[:, A:A + 1].set(params["v_b3"])

    return {"w1": w1, "b1": b1, "w2": w2, "b2": b2, "w3": w3, "b3": b3}


# -----------------------------------------------------------------------------
# Wrapper
# -----------------------------------------------------------------------------
def actor_critic_evaluate(state, action, packed, *, action_dim, block_b=2048):
    """Pallas equivalent of ActorCritic.evaluate(state, action).

    Args:
      state:  f32[B, state_dim]
      action: int[B]
      packed: output of pack_params() (fused, lane-padded weights)
      action_dim: number of discrete actions (static)
      block_b: max batch rows per grid step (rounded to a multiple of 128)

    Returns:
      (action_logprobs f32[B], state_value f32[B], dist_entropy f32[B])
    """
    f32 = jnp.float32
    B, S = state.shape
    Sx, Hp = packed["w1"].shape
    Op = packed["w3"].shape[1]
    assert Sx == S + 1, "packed params do not match state_dim"

    # Batch tiling: TB multiple of 128 (batch lives on lanes of the transposed
    # output); aim for >= 2 grid steps so v7x's two TensorCores both get work.
    block_b = max(128, _round_up(block_b, 128))
    TB = min(block_b, max(128, _round_up(pl.cdiv(B, 2), 128)))
    grid_b = pl.cdiv(B, TB)
    B_pad = grid_b * TB

    # Merge the action into the state tile as one extra (exact) f32 column.
    x = jnp.concatenate(
        [state.astype(f32), action.astype(f32).reshape(B, 1)], axis=1)      # [B, S+1]
    if B_pad != B:
        x = jnp.pad(x, ((0, B_pad - B), (0, 0)))

    kernel = functools.partial(actor_critic_kernel, state_dim=S, action_dim=action_dim)

    row_map = lambda i: (i, 0)
    const_map = lambda i: (0, 0)

    out = pl.pallas_call(
        kernel,
        grid=(grid_b,),
        out_shape=jax.ShapeDtypeStruct((8, B_pad), f32),
        in_specs=[
            pl.BlockSpec((TB, Sx), row_map),        # state+action tile (pipelined)
            pl.BlockSpec((Sx, Hp), const_map),      # W1 (VMEM-resident)
            pl.BlockSpec((1, Hp), const_map),       # b1
            pl.BlockSpec((Hp, Hp), const_map),      # W2
            pl.BlockSpec((1, Hp), const_map),       # b2
            pl.BlockSpec((Hp, Op), const_map),      # W3
            pl.BlockSpec((1, Op), const_map),       # b3
        ],
        out_specs=pl.BlockSpec((8, TB), lambda i: (0, i)),     # lane-dense, transposed
        compiler_params=pltpu.CompilerParams(
            dimension_semantics=("parallel",),
            vmem_limit_bytes=32 << 20,              # v7x-safe scoped VMEM budget
        ),
    )(x, packed["w1"], packed["b1"], packed["w2"], packed["b2"],
      packed["w3"], packed["b3"])

    # Contiguous row slices; torch.squeeze(state_value) -> [B].
    return out[0, :B], out[1, :B], out[2, :B]


# -----------------------------------------------------------------------------
# Deterministic parameter init (PyTorch nn.Linear default: U(-1/sqrt(in), 1/sqrt(in)))
# -----------------------------------------------------------------------------
def init_params(key, state_dim, action_dim, n_latent_var):
    def linear(key, fan_in, fan_out):
        kw, kb = jax.random.split(key)
        bound = 1.0 / jnp.sqrt(jnp.float32(fan_in))
        # Stored as [in, out] (transposed vs torch's [out, in]) for x @ W.
        w = jax.random.uniform(kw, (fan_in, fan_out), jnp.float32, -bound, bound)
        b = jax.random.uniform(kb, (1, fan_out), jnp.float32, -bound, bound)
        return w, b

    keys = jax.random.split(key, 6)
    p = {}
    p["a_w1"], p["a_b1"] = linear(keys[0], state_dim, n_latent_var)
    p["a_w2"], p["a_b2"] = linear(keys[1], n_latent_var, n_latent_var)
    p["a_w3"], p["a_b3"] = linear(keys[2], n_latent_var, action_dim)
    p["v_w1"], p["v_b1"] = linear(keys[3], state_dim, n_latent_var)
    p["v_w2"], p["v_b2"] = linear(keys[4], n_latent_var, n_latent_var)
    p["v_w3"], p["v_b3"] = linear(keys[5], n_latent_var, 1)
    return p


# -----------------------------------------------------------------------------
# Pure-JAX reference for sanity check
# -----------------------------------------------------------------------------
def reference_evaluate(state, action, params):
    h = jnp.tanh(state @ params["a_w1"] + params["a_b1"])
    h = jnp.tanh(h @ params["a_w2"] + params["a_b2"])
    logits = h @ params["a_w3"] + params["a_b3"]
    probs = jax.nn.softmax(logits, axis=-1)
    logp = jnp.log(probs)
    logprob = jnp.take_along_axis(logp, action[:, None], axis=-1)[:, 0]
    entropy = -jnp.sum(probs * logp, axis=-1)
    hv = jnp.tanh(state @ params["v_w1"] + params["v_b1"])
    hv = jnp.tanh(hv @ params["v_w2"] + params["v_b2"])
    value = (hv @ params["v_w3"] + params["v_b3"])[:, 0]
    return logprob, value, entropy


# TODO(synk): ActorCritic.act()'s Categorical.sample() (stochastic draw) is not
# reproduced here; only the deterministic evaluate() forward path is kernelized.

if __name__ == "__main__":
    import numpy as np

    STATE_DIM, ACTION_DIM, N_LATENT = 8, 4, 32
    key = jax.random.PRNGKey(0)
    k_params, k_state, k_action, k_state2, k_action2 = jax.random.split(key, 5)
    params = init_params(k_params, STATE_DIM, ACTION_DIM, N_LATENT)

    # Weight packing hoisted out of the per-call path: done exactly once here.
    packed = jax.tree_util.tree_map(jax.block_until_ready, pack_params(params))

    eval_jit = jax.jit(actor_critic_evaluate, static_argnames=("action_dim",))

    def check(state, action):
        logprob, value, entropy = eval_jit(state, action, packed, action_dim=ACTION_DIM)
        jax.block_until_ready((logprob, value, entropy))
        ref_lp, ref_v, ref_e = reference_evaluate(state, action, params)
        np.testing.assert_allclose(np.asarray(logprob), np.asarray(ref_lp),
                                   rtol=1e-5, atol=1e-5)
        np.testing.assert_allclose(np.asarray(value), np.asarray(ref_v),
                                   rtol=1e-5, atol=1e-5)
        # Entropy uses pl.reciprocal(approx=True) (EUP) -> slightly looser tolerance.
        np.testing.assert_allclose(np.asarray(entropy), np.asarray(ref_e),
                                   rtol=1e-3, atol=1e-3)

    # Small single-tile case.
    B = 8
    state = jax.random.normal(k_state, (B, STATE_DIM), dtype=jnp.float32)
    action = jax.random.randint(k_action, (B,), 0, ACTION_DIM, dtype=jnp.int32)
    check(state, action)

    # Multi-tile case with a ragged remainder (exercises grid + padding path
    # and the >=2-step split for v7x's two TensorCores).
    B2 = 600
    state2 = jax.random.normal(k_state2, (B2, STATE_DIM), dtype=jnp.float32)
    action2 = jax.random.randint(k_action2, (B2,), 0, ACTION_DIM, dtype=jnp.int32)
    check(state2, action2)

    print("KERNEL_OK")
</pallas_src>

<mosaic_0001>
module attributes {stable_mosaic.version = 11 : i64} {
  func.func @actor_critic_kernel(%arg0: i32, %arg1: memref<128x9xf32, #tpu.memory_space<vmem>>, %arg2: memref<9x128xf32, #tpu.memory_space<vmem>>, %arg3: memref<1x128xf32, #tpu.memory_space<vmem>>, %arg4: memref<128x128xf32, #tpu.memory_space<vmem>>, %arg5: memref<1x128xf32, #tpu.memory_space<vmem>>, %arg6: memref<128x128xf32, #tpu.memory_space<vmem>>, %arg7: memref<1x128xf32, #tpu.memory_space<vmem>>, %arg8: memref<8x128xf32, #tpu.memory_space<vmem>>) attributes {dimension_semantics = [#tpu.dimension_semantics<parallel>], iteration_bounds = array<i64: 1>, scalar_prefetch = 0 : i64, scratch_operands = 0 : i64, tpu.core_type = #tpu.core_type<tc>, window_params = [{transform_indices = @transform_0, window_bounds = array<i64: 128, 9>}, {pipeline_mode = #tpu.pipeline_mode<synchronous>, transform_indices = @transform_1, window_bounds = array<i64: 9, 128>}, {pipeline_mode = #tpu.pipeline_mode<synchronous>, transform_indices = @transform_2, window_bounds = array<i64: 1, 128>}, {pipeline_mode = #tpu.pipeline_mode<synchronous>, transform_indices = @transform_3, window_bounds = array<i64: 128, 128>}, {pipeline_mode = #tpu.pipeline_mode<synchronous>, transform_indices = @transform_4, window_bounds = array<i64: 1, 128>}, {pipeline_mode = #tpu.pipeline_mode<synchronous>, transform_indices = @transform_5, window_bounds = array<i64: 128, 128>}, {pipeline_mode = #tpu.pipeline_mode<synchronous>, transform_indices = @transform_6, window_bounds = array<i64: 1, 128>}, {transform_indices = @transform_7, window_bounds = array<i64: 8, 128>}]} {
    %c0 = arith.constant 0 : index
    %c0_0 = arith.constant 0 : index
    %0 = vector.load %arg1[%c0, %c0_0] : memref<128x9xf32, #tpu.memory_space<vmem>>, vector<128x9xf32>
    %c0_1 = arith.constant 0 : index
    %c0_2 = arith.constant 0 : index
    %1 = vector.load %arg2[%c0_1, %c0_2] : memref<9x128xf32, #tpu.memory_space<vmem>>, vector<9x128xf32>
    %cst = arith.constant dense<0.000000e+00> : vector<128x128xf32>
    %2 = tpu.matmul %0, %1, %cst {dimension_numbers = #tpu.dot_dimension_numbers<[1], [0], [0], [1], [0, 0, 1, 1], [], []>} : vector<128x9xf32>, vector<9x128xf32>, vector<128x128xf32> -> vector<128x128xf32>
    %c0_3 = arith.constant 0 : index
    %c0_4 = arith.constant 0 : index
    %3 = vector.load %arg3[%c0_3, %c0_4] : memref<1x128xf32, #tpu.memory_space<vmem>>, vector<1x128xf32>
    %4 = vector.broadcast %3 : vector<1x128xf32> to vector<128x128xf32>
    %5 = arith.addf %2, %4 : vector<128x128xf32>
    %6 = math.tanh %5 : vector<128x128xf32>
    %c0_5 = arith.constant 0 : index
    %c0_6 = arith.constant 0 : index
    %7 = vector.load %arg4[%c0_5, %c0_6] : memref<128x128xf32, #tpu.memory_space<vmem>>, vector<128x128xf32>
    %cst_7 = arith.constant dense<0.000000e+00> : vector<128x128xf32>
    %8 = tpu.matmul %6, %7, %cst_7 {dimension_numbers = #tpu.dot_dimension_numbers<[1], [0], [0], [1], [0, 0, 1, 1], [], []>} : vector<128x128xf32>, vector<128x128xf32>, vector<128x128xf32> -> vector<128x128xf32>
    %c0_8 = arith.constant 0 : index
    %c0_9 = arith.constant 0 : index
    %9 = vector.load %arg5[%c0_8, %c0_9] : memref<1x128xf32, #tpu.memory_space<vmem>>, vector<1x128xf32>
    %10 = vector.broadcast %9 : vector<1x128xf32> to vector<128x128xf32>
    %11 = arith.addf %8, %10 : vector<128x128xf32>
    %12 = math.tanh %11 : vector<128x128xf32>
    %c0_10 = arith.constant 0 : index
    %c0_11 = arith.constant 0 : index
    %13 = vector.load %arg6[%c0_10, %c0_11] : memref<128x128xf32, #tpu.memory_space<vmem>>, vector<128x128xf32>
    %cst_12 = arith.constant dense<0.000000e+00> : vector<128x128xf32>
    %14 = tpu.matmul %12, %13, %cst_12 {dimension_numbers = #tpu.dot_dimension_numbers<[1], [0], [0], [1], [0, 0, 1, 1], [], []>} : vector<128x128xf32>, vector<128x128xf32>, vector<128x128xf32> -> vector<128x128xf32>
    %c0_13 = arith.constant 0 : index
    %c0_14 = arith.constant 0 : index
    %15 = vector.load %arg7[%c0_13, %c0_14] : memref<1x128xf32, #tpu.memory_space<vmem>>, vector<1x128xf32>
    %16 = vector.broadcast %15 : vector<1x128xf32> to vector<128x128xf32>
    %17 = arith.addf %14, %16 : vector<128x128xf32>
    %18 = tpu.iota {dimensions = array<i32: 1>} : vector<128x128xi32>
    %c4_i32 = arith.constant 4 : i32
    %19 = vector.broadcast %c4_i32 : i32 to vector<128x128xi32>
    %20 = arith.cmpi slt, %18, %19 : vector<128x128xi32>
    %cst_15 = arith.constant -1.000000e+30 : f32
    %21 = vector.broadcast %cst_15 : f32 to vector<128x128xf32>
    %22 = arith.select %20, %17, %21 : vector<128x128xi1>, vector<128x128xf32>
    %cst_16 = arith.constant dense<0xFF800000> : vector<128xf32>
    %23 = vector.multi_reduction <maximumf>, %22, %cst_16 [1] : vector<128x128xf32> to vector<128xf32>
    %24 = vector.shape_cast %23 : vector<128xf32> to vector<128x1xf32>
    %25 = vector.broadcast %24 : vector<128x1xf32> to vector<128x128xf32>
    %26 = arith.subf %22, %25 : vector<128x128xf32>
    %27 = math.exp %26 : vector<128x128xf32>
    %cst_17 = arith.constant dense<0.000000e+00> : vector<128xf32>
    %28 = vector.multi_reduction <add>, %27, %cst_17 [1] : vector<128x128xf32> to vector<128xf32>
    %29 = vector.shape_cast %28 : vector<128xf32> to vector<128x1xf32>
    %30 = math.log %29 : vector<128x1xf32>
    %31 = tpu.reciprocal %29 {approx = true} : vector<128x1xf32> -> vector<128x1xf32>
    %32 = vector.extract_strided_slice %17 {offsets = [0, 4], sizes = [128, 1], strides = [1, 1]} : vector<128x128xf32> to vector<128x1xf32>
    %33 = vector.extract_strided_slice %0 {offsets = [0, 8], sizes = [128, 1], strides = [1, 1]} : vector<128x9xf32> to vector<128x1xf32>
    %34 = arith.fptosi %33 : vector<128x1xf32> to vector<128x1xi32>
    %35 = vector.broadcast %30 : vector<128x1xf32> to vector<128x128xf32>
    %36 = arith.subf %26, %35 : vector<128x128xf32>
    %37 = vector.broadcast %34 : vector<128x1xi32> to vector<128x128xi32>
    %38 = arith.cmpi eq, %18, %37 : vector<128x128xi32>
    %cst_18 = arith.constant 0.000000e+00 : f32
    %39 = vector.broadcast %cst_18 : f32 to vector<128x128xf32>
    %40 = arith.select %38, %36, %39 : vector<128x128xi1>, vector<128x128xf32>
    %cst_19 = arith.constant dense<0.000000e+00> : vector<128xf32>
    %41 = vector.multi_reduction <add>, %40, %cst_19 [1] : vector<128x128xf32> to vector<128xf32>
    %42 = vector.shape_cast %41 : vector<128xf32> to vector<128x1xf32>
    %43 = arith.mulf %27, %26 : vector<128x128xf32>
    %cst_20 = arith.constant dense<0.000000e+00> : vector<128xf32>
    %44 = vector.multi_reduction <add>, %43, %cst_20 [1] : vector<128x128xf32> to vector<128xf32>
    %45 = vector.shape_cast %44 : vector<128xf32> to vector<128x1xf32>
    %46 = arith.mulf %45, %31 : vector<128x1xf32>
    %47 = arith.subf %30, %46 : vector<128x1xf32>
    %c0_i32 = arith.constant 0 : i32
    %48 = vector.broadcast %c0_i32 : i32 to vector<128x128xi32>
    %49 = arith.cmpi eq, %18, %48 : vector<128x128xi32>
    %cst_21 = arith.constant 0.000000e+00 : f32
    %50 = vector.shape_cast %42 : vector<128x1xf32> to vector<128x1xf32>
    %51 = vector.broadcast %50 : vector<128x1xf32> to vector<128x128xf32>
    %52 = vector.broadcast %cst_21 : f32 to vector<128x128xf32>
    %53 = arith.select %49, %51, %52 : vector<128x128xi1>, vector<128x128xf32>
    %c1_i32 = arith.constant 1 : i32
    %54 = vector.broadcast %c1_i32 : i32 to vector<128x128xi32>
    %55 = arith.cmpi eq, %18, %54 : vector<128x128xi32>
    %cst_22 = arith.constant 0.000000e+00 : f32
    %56 = vector.shape_cast %32 : vector<128x1xf32> to vector<128x1xf32>
    %57 = vector.broadcast %56 : vector<128x1xf32> to vector<128x128xf32>
    %58 = vector.broadcast %cst_22 : f32 to vector<128x128xf32>
    %59 = arith.select %55, %57, %58 : vector<128x128xi1>, vector<128x128xf32>
    %60 = arith.addf %53, %59 : vector<128x128xf32>
    %c2_i32 = arith.constant 2 : i32
    %61 = vector.broadcast %c2_i32 : i32 to vector<128x128xi32>
    %62 = arith.cmpi eq, %18, %61 : vector<128x128xi32>
    %cst_23 = arith.constant 0.000000e+00 : f32
    %63 = vector.shape_cast %47 : vector<128x1xf32> to vector<128x1xf32>
    %64 = vector.broadcast %63 : vector<128x1xf32> to vector<128x128xf32>
    %65 = vector.broadcast %cst_23 : f32 to vector<128x128xf32>
    %66 = arith.select %62, %64, %65 : vector<128x128xi1>, vector<128x128xf32>
    %67 = arith.addf %60, %66 : vector<128x128xf32>
    %68 = tpu.iota {dimensions = array<i32: 0>} : vector<8x128xi32>
    %69 = tpu.iota {dimensions = array<i32: 1>} : vector<8x128xi32>
    %70 = arith.cmpi eq, %68, %69 : vector<8x128xi32>
    %71 = arith.extui %70 : vector<8x128xi1> to vector<8x128xi32>
    %72 = arith.sitofp %71 : vector<8x128xi32> to vector<8x128xf32>
    %cst_24 = arith.constant dense<0.000000e+00> : vector<8x128xf32>
    %73 = tpu.matmul %72, %67, %cst_24 {dimension_numbers = #tpu.dot_dimension_numbers<[1], [1], [0], [0], [0, 0, 1, 0], [], []>} : vector<8x128xf32>, vector<128x128xf32>, vector<8x128xf32> -> vector<8x128xf32>
    %c0_25 = arith.constant 0 : index
    %c0_26 = arith.constant 0 : index
    %74 = vector.load %arg8[%c0_25, %c0_26] : memref<8x128xf32, #tpu.memory_space<vmem>>, vector<8x128xf32>
    tpu.vector_store %arg8[%c0_25, %c0_26], %73 {strides = array<i32>} : memref<8x128xf32, #tpu.memory_space<vmem>>, vector<8x128xf32>,
    return
  }
  func.func @transform_0(%arg0: i32) -> (i32, i32) {
    %c0_i32 = arith.constant 0 : i32
    %c0_i32_0 = arith.constant 0 : i32
    return %arg0, %c0_i32 : i32, i32
  }
  func.func @transform_1(%arg0: i32) -> (i32, i32) {
    %c0_i32 = arith.constant 0 : i32
    %c0_i32_0 = arith.constant 0 : i32
    %c0_i32_1 = arith.constant 0 : i32
    return %c0_i32, %c0_i32_0 : i32, i32
  }
  func.func @transform_2(%arg0: i32) -> (i32, i32) {
    %c0_i32 = arith.constant 0 : i32
    %c0_i32_0 = arith.constant 0 : i32
    %c0_i32_1 = arith.constant 0 : i32
    return %c0_i32, %c0_i32_0 : i32, i32
  }
  func.func @transform_3(%arg0: i32) -> (i32, i32) {
    %c0_i32 = arith.constant 0 : i32
    %c0_i32_0 = arith.constant 0 : i32
    %c0_i32_1 = arith.constant 0 : i32
    return %c0_i32, %c0_i32_0 : i32, i32
  }
  func.func @transform_4(%arg0: i32) -> (i32, i32) {
    %c0_i32 = arith.constant 0 : i32
    %c0_i32_0 = arith.constant 0 : i32
    %c0_i32_1 = arith.constant 0 : i32
    return %c0_i32, %c0_i32_0 : i32, i32
  }
  func.func @transform_5(%arg0: i32) -> (i32, i32) {
    %c0_i32 = arith.constant 0 : i32
    %c0_i32_0 = arith.constant 0 : i32
    %c0_i32_1 = arith.constant 0 : i32
    return %c0_i32, %c0_i32_0 : i32, i32
  }
  func.func @transform_6(%arg0: i32) -> (i32, i32) {
    %c0_i32 = arith.constant 0 : i32
    %c0_i32_0 = arith.constant 0 : i32
    %c0_i32_1 = arith.constant 0 : i32
    return %c0_i32, %c0_i32_0 : i32, i32
  }
  func.func @transform_7(%arg0: i32) -> (i32, i32) {
    %c0_i32 = arith.constant 0 : i32
    %c0_i32_0 = arith.constant 0 : i32
    return %c0_i32, %arg0 : i32, i32
  }
}

</mosaic_0001>

<bundles_post_ra>
// kernel: actor_critic_evaluate.1
= control target key start
LH: loop header
LB: loop body
LE: loop exit
PB: predicated region body
PF: predicated region fallthrough
CT: control target
= control target key end

     0   :  { %12 = vsyncpa [#allocation3], 0  ;;  %s1800_s24 = smov [#allocation2]   ;;  %s2676_s0 = inlined_call_operand.vmem [shape: f32[128,9], index: 0, kind: input, shape index: {}]   ;;  %s2677_s1 = inlined_call_operand.vmem [shape: f32[9,128], index: 1, kind: input, shape index: {}]   ;;  %s2678_s2 = inlined_call_operand.vmem [shape: f32[1,128], index: 2, kind: input, shape index: {}]   ;;  %s2679_s3 = inlined_call_operand.vmem [shape: f32[128,128], index: 3, kind: input, shape index: {}]   ;;  %s2680_s4 = inlined_call_operand.vmem [shape: f32[1,128], index: 4, kind: input, shape index: {}]   ;;  %s2681_s5 = inlined_call_operand.hbm [shape: f32[128,128], index: 5, kind: input, shape index: {}]   ;;  %s2682_s6 = inlined_call_operand.vmem [shape: f32[1,128], index: 6, kind: input, shape index: {}]   ;;  %s2683_s7 = inlined_call_operand.vmem [shape: f32[8,128], index: 7, kind: output, shape index: {}]  }
   0x1   :  { %s28_s25 = sshll.u32 %s1800_s24, 4  ;;  %s29_s25 = int_to_ptr.vmem [resolvable:$true] %s28_s25 }
   0x2   :  { %s1786_s26 = scalar_lea.vmem %s29_s25, 2048  ;;  %p1791_p1 = scmp.lt.s32.totalorder %s29_s25, %s29_s25 }
   0x3   :  { %p1787_p0 = scmp.ne.s32.totalorder %s29_s25, %s1786_s26  ;;  %p1792_p2 = scmp.lt.s32.totalorder %s1786_s26, %s1786_s26 }
   0x5   :  { %p1793_p3 = por %p1792_p2, %p1791_p1 }
   0x7   :  { %p1794_p4 = pnand %p1793_p3, %p1787_p0 }
   0x9   :  { %1797 = shalt.err (!%p1794_p4)
}
   0xa   :  { %s1801_s27 = smov 128   ;;  %s1802_s28 = smov 8  }
   0xb   :  { %34 = dma.hbm_to_vmem [thread:$0]  %s2681_s5, 2048, %s29_s25, [#allocation3], %s1801_s27, %s1801_s27, %s1802_s28  }
   0xc   :  { %1798 = dma.done.wait [#allocation3], 2048  }
   0xd   :  { %1799 = vsyncadd [#allocation3], 4294965248  ;;  %vm114_vm0 = vcmask 1040384   ;;  %vm65_vm1 = vcmask 72704   ;;  %v57_v0 = vld [vmem:[%s2677_s1 + $0x8] sm:$0x1] }
   0xe   :  { %v56_v1 = vld [vmem:[%s2677_s1] sm:$0xff]  ;;  %1399 = vmatprep.subr.msk.mxu0 %vm114_vm0, %v57_v0  ;;  %v1867_v3 = vld [vmem:[%s2676_s0 + $0x8] sm:$0xff]  ;;  %v1872_v4 = vld [vmem:[%s2676_s0 + $0x10] sm:$0xff] }
   0xf   :  { %v1860_v2 = vld [vmem:[%s2676_s0] sm:$0xff]  ;;  %1400 = vmatpush3.msk.msra.mxu0 %vm114_vm0, %v57_v0  ;;  %v1881_v5 = vld [vmem:[%s2676_s0 + $0x18] sm:$0xff]  ;;  %v293_v7 = vld [vmem:[%s2679_s3 + $0x70] sm:$0xff] }
  0x10   :  { %1403 = vmatprep.mubr.msk.f32.mxu0 %vm65_vm1, %v1860_v2  ;;  %1401 = vmatprep.subr.mxu0 %v56_v1  ;;  %v294_v6 = vld [vmem:[%s2679_s3 + $0x78] sm:$0xff]  ;;  %v1892_v8 = vld [vmem:[%s2676_s0 + $0x20] sm:$0xff]  ;;  %v292_v9 = vld [vmem:[%s2679_s3 + $0x68] sm:$0xff] }
  0x11   :  { %1402 = vmatpush3.msra.mxu0 %v56_v1  ;;  %1427 = vmatprep.subr.mxu1 %v294_v6  ;;  %v1904_v10 = vld [vmem:[%s2676_s0 + $0x28] sm:$0xff]  ;;  %v291_v11 = vld [vmem:[%s2679_s3 + $0x60] sm:$0xff]  ;;  %v1912_v12 = vld [vmem:[%s2676_s0 + $0x30] sm:$0xff] }
  0x12   :  { %1404 = vmatmul.mubr.msk.f32.vlgmr.msra.gmra.mxu0 %vm65_vm1, %v1867_v3  ;;  %1428 = vmatpush3.msra.mxu1 %v294_v6  ;;  %v290_v13 = vld [vmem:[%s2679_s3 + $0x58] sm:$0xff]  ;;  %v289_v15 = vld [vmem:[%s2679_s3 + $0x50] sm:$0xff]  ;;  %v1932_v16 = vld [vmem:[%s2676_s0 + $0x40] sm:$0xff] }
  0x13   :  { %1406 = vmatprep.mubr.msk.f32.mxu0 %vm65_vm1, %v1872_v4  ;;  %1429 = vmatprep.subr.mxu1 %v293_v7  ;;  %v1924_v14 = vld [vmem:[%s2676_s0 + $0x38] sm:$0xff]  ;;  %v1941_v17 = vld [vmem:[%s2676_s0 + $0x48] sm:$0xff]  ;;  %v1946_v18 = vld [vmem:[%s2676_s0 + $0x50] sm:$0xff] }
  0x14   :  { %1430 = vmatpush3.msra.mxu1 %v293_v7  ;;  %v1955_v19 = vld [vmem:[%s2676_s0 + $0x58] sm:$0xff]  ;;  %v1960_v20 = vld [vmem:[%s2676_s0 + $0x60] sm:$0xff]  ;;  %v1969_v21 = vld [vmem:[%s2676_s0 + $0x68] sm:$0xff] }
  0x15   :  { %1431 = vmatprep.subr.mxu1 %v292_v9  ;;  %v1974_v22 = vld [vmem:[%s2676_s0 + $0x70] sm:$0xff]  ;;  %v1983_v23 = vld [vmem:[%s2676_s0 + $0x78] sm:$0xff]  ;;  %v288_v24 = vld [vmem:[%s2679_s3 + $0x48] sm:$0xff] }
  0x16   :  { %1407 = vmatmul.mubr.msk.f32.gmra.mxu0 %vm65_vm1, %v1881_v5  ;;  %1432 = vmatpush3.msra.mxu1 %v292_v9  ;;  %v287_v25 = vld [vmem:[%s2679_s3 + $0x40] sm:$0xff]  ;;  %v286_v26 = vld [vmem:[%s2679_s3 + $0x38] sm:$0xff]  ;;  %v285_v27 = vld [vmem:[%s2679_s3 + $0x30] sm:$0xff] }
  0x17   :  { %1409 = vmatprep.mubr.msk.f32.mxu0 %vm65_vm1, %v1892_v8  ;;  %1433 = vmatprep.subr.mxu1 %v291_v11  ;;  %v284_v28 = vld [vmem:[%s2679_s3 + $0x28] sm:$0xff]  ;;  %v283_v29 = vld [vmem:[%s2679_s3 + $0x20] sm:$0xff]  ;;  %v282_v30 = vld [vmem:[%s2679_s3 + $0x18] sm:$0xff] }
  0x18   :  { %1434 = vmatpush3.msra.mxu1 %v291_v11  ;;  %v281_v31 = vld [vmem:[%s2679_s3 + $0x10] sm:$0xff]  ;;  %v280_v32 = vld [vmem:[%s2679_s3 + $0x8] sm:$0xff]  ;;  %v279_v33 = vld [vmem:[%s2679_s3] sm:$0xff] }
  0x19   :  { %1435 = vmatprep.subr.mxu1 %v290_v13  ;;  %v478_v34 = vld [vmem:[#allocation2 + $0x78] sm:$0xff]  ;;  %v477_v35 = vld [vmem:[#allocation2 + $0x70] sm:$0xff]  ;;  %v476_v36 = vld [vmem:[#allocation2 + $0x68] sm:$0xff] }
  0x1a   :  { %1410 = vmatmul.mubr.msk.f32.gmra.mxu0 %vm65_vm1, %v1904_v10  ;;  %1436 = vmatpush3.msra.mxu1 %v290_v13  ;;  %v475_v37 = vld [vmem:[#allocation2 + $0x60] sm:$0xff]  ;;  %v474_v38 = vld [vmem:[#allocation2 + $0x58] sm:$0xff]  ;;  %v473_v39 = vld [vmem:[#allocation2 + $0x50] sm:$0xff] }
  0x1b   :  { %1412 = vmatprep.mubr.msk.f32.mxu0 %vm65_vm1, %v1912_v12  ;;  %1437 = vmatprep.subr.mxu1 %v289_v15  ;;  %v472_v40 = vld [vmem:[#allocation2 + $0x48] sm:$0xff]  ;;  %v1278_v41 = vld [vmem:[%s2678_s2] ss:$0 sm:$0xff] }
  0x1c   :  { %1438 = vmatpush3.msra.mxu1 %v289_v15  ;;  %1483 = vmatprep.subr.mxu0 %v478_v34 }
  0x1d   :  { %1439 = vmatprep.subr.mxu1 %v288_v24  ;;  %1484 = vmatpush3.msra.mxu0 %v478_v34 }
  0x1e   :  { %1413 = vmatmul.mubr.msk.f32.gmra.mxu0 %vm65_vm1, %v1924_v14  ;;  %1440 = vmatpush3.msra.mxu1 %v288_v24 }
  0x1f   :  { %1415 = vmatprep.mubr.msk.f32.mxu0 %vm65_vm1, %v1932_v16  ;;  %1441 = vmatprep.subr.mxu1 %v287_v25 }
  0x20   :  { %1442 = vmatpush3.msra.mxu1 %v287_v25  ;;  %1485 = vmatprep.subr.mxu0 %v477_v35 }
  0x21   :  { %1443 = vmatprep.subr.mxu1 %v286_v26  ;;  %1486 = vmatpush3.msra.mxu0 %v477_v35 }
  0x22   :  { %1416 = vmatmul.mubr.msk.f32.gmra.mxu0 %vm65_vm1, %v1941_v17  ;;  %1444 = vmatpush3.msra.mxu1 %v286_v26 }
  0x23   :  { %1418 = vmatprep.mubr.msk.f32.mxu0 %vm65_vm1, %v1946_v18  ;;  %1445 = vmatprep.subr.mxu1 %v285_v27 }
  0x24   :  { %1446 = vmatpush3.msra.mxu1 %v285_v27  ;;  %1487 = vmatprep.subr.mxu0 %v476_v36 }
  0x25   :  { %1447 = vmatprep.subr.mxu1 %v284_v28  ;;  %1488 = vmatpush3.msra.mxu0 %v476_v36 }
  0x26   :  { %1419 = vmatmul.mubr.msk.f32.gmra.mxu0 %vm65_vm1, %v1955_v19  ;;  %1448 = vmatpush3.msra.mxu1 %v284_v28 }
  0x27   :  { %1421 = vmatprep.mubr.msk.f32.mxu0 %vm65_vm1, %v1960_v20  ;;  %1449 = vmatprep.subr.mxu1 %v283_v29 }
  0x28   :  { %1450 = vmatpush3.msra.mxu1 %v283_v29  ;;  %1489 = vmatprep.subr.mxu0 %v475_v37 }
  0x29   :  { %1451 = vmatprep.subr.mxu1 %v282_v30  ;;  %1490 = vmatpush3.msra.mxu0 %v475_v37 }
  0x2a   :  { %1422 = vmatmul.mubr.msk.f32.gmra.mxu0 %vm65_vm1, %v1969_v21  ;;  %1452 = vmatpush3.msra.mxu1 %v282_v30 }
  0x2b   :  { %1424 = vmatprep.mubr.msk.f32.mxu0 %vm65_vm1, %v1974_v22  ;;  %1453 = vmatprep.subr.mxu1 %v281_v31 }
  0x2c   :  { %1454 = vmatpush3.msra.mxu1 %v281_v31  ;;  %1491 = vmatprep.subr.mxu0 %v474_v38 }
  0x2d   :  { %1455 = vmatprep.subr.mxu1 %v280_v32  ;;  %1492 = vmatpush3.msra.mxu0 %v474_v38 }
  0x2e   :  { %1425 = vmatmul.mubr.msk.f32.gmra.mxu0 %vm65_vm1, %v1983_v23  ;;  %1456 = vmatpush3.msra.mxu1 %v280_v32 }
  0x2f   :  { %1457 = vmatprep.subr.mxu1 %v279_v33  ;;  %1493 = vmatprep.subr.mxu0 %v473_v39 }
  0x30   :  { %1458 = vmatpush3.msra.mxu1 %v279_v33  ;;  %1494 = vmatpush3.msra.mxu0 %v473_v39 }
  0x31   :  { %1495 = vmatprep.subr.mxu0 %v472_v40 }
  0x32   :  { %1496 = vmatpush3.msra.mxu0 %v472_v40 }
  0xd2   :  { %v1405_v42 = vpop.f32.mrf.mxu0 }
  0xd3   :  { %v190_v43 = vadd.f32 %v1405_v42, %v1278_v41 }
  0xd4   :  { %v184_v44 = vpop.f32.mrf.mxu0 }
  0xd5   :  { %v185_v45 = vadd.f32 %v1278_v41, %v184_v44  ;;  %v469_v44 = vld [vmem:[#allocation2 + $0x30] sm:$0xff] }
  0xd6   :  { %v1408_v46 = vpop.f32.mrf.mxu0 }
  0xd7   :  { %1618 = vtanh.f32 %v185_v45  ;;  %v200_v47 = vadd.f32 %v1408_v46, %v1278_v41  ;;  %v468_v45 = vld [vmem:[#allocation2 + $0x28] sm:$0xff]  ;;  %v467_v46 = vld [vmem:[#allocation2 + $0x20] sm:$0xff] }
  0xd8   :  { %1620 = vtanh.f32 %v190_v43  ;;  %v194_v48 = vpop.f32.mrf.mxu0  ;;  %v470_v43 = vld [vmem:[#allocation2 + $0x38] sm:$0xff] }
  0xd9   :  { %v195_v49 = vadd.f32 %v1278_v41, %v194_v48  ;;  %v465_v48 = vld [vmem:[#allocation2 + $0x10] sm:$0xff] }
  0xda   :  { %v1411_v50 = vpop.f32.mrf.mxu0 }
  0xdb   :  { %1622 = vtanh.f32 %v195_v49  ;;  %v210_v51 = vadd.f32 %v1411_v50, %v1278_v41  ;;  %v464_v49 = vld [vmem:[#allocation2 + $0x8] sm:$0xff]  ;;  %v463_v50 = vld [vmem:[#allocation2] sm:$0xff] }
  0xdc   :  { %1624 = vtanh.f32 %v200_v47  ;;  %v204_v52 = vpop.f32.mrf.mxu0  ;;  %v466_v47 = vld [vmem:[#allocation2 + $0x18] sm:$0xff] }
  0xdd   :  { %v205_v53 = vadd.f32 %v1278_v41, %v204_v52  ;;  %v1600_v52 = vtrunc.f32 %v1969_v21 }
  0xde   :  { %v1414_v54 = vpop.f32.mrf.mxu0 }
  0xdf   :  { %1626 = vtanh.f32 %v205_v53  ;;  %v220_v55 = vadd.f32 %v1414_v54, %v1278_v41  ;;  %v1803_v53 = vmov 8  }
  0xe0   :  { %1628 = vtanh.f32 %v210_v51  ;;  %v214_v56 = vpop.f32.mrf.mxu0  ;;  %v1602_v51 = vtrunc.f32 %v1974_v22  ;;  %1615 = vset.pattern.permute.xlu0 %v1803_v53  ;;  %1614 = vset.pattern.permute.xlu1 %v1803_v53  ;;  %v1574_v22 = vtrunc.f32 %v1860_v2  ;;  %v1588_v2 = vtrunc.f32 %v1924_v14 }
  0xe1   :  { %v215_v57 = vadd.f32 %v1278_v41, %v214_v56  ;;  %v1598_v56 = vtrunc.f32 %v1960_v20  ;;  %v1576_v14 = vtrunc.f32 %v1867_v3 }
  0xe2   :  { %v1417_v58 = vpop.f32.mrf.mxu0  ;;  %v1603_v54 = vcvt.f32.s32 %v1602_v51 }
  0xe3   :  { %1630 = vtanh.f32 %v215_v57  ;;  %v230_v59 = vadd.f32 %v1417_v58, %v1278_v41  ;;  %v1599_v57 = vcvt.f32.s32 %v1598_v56  ;;  %v1596_v58 = vtrunc.f32 %v1955_v19 }
  0xe4   :  { %v1619_v60 = vpop.eup %1618  ;;  %1632 = vtanh.f32 %v220_v55  ;;  %v224_v61 = vpop.f32.mrf.mxu0  ;;  %885 = vperm.xlu0 %1615, %v1603_v54   ;;  %v1601_v55 = vcvt.f32.s32 %v1600_v52 }
  0xe5   :  { %v1621_v62 = vpop.eup %1620  ;;  %1459 = vmatprep.mubr.f32.mxu1 %v1619_v60  ;;  %v225_v63 = vadd.f32 %v1278_v41, %v224_v61  ;;  %1634 = vtanh.f32 %v230_v59  ;;  %v1604_v59 = vtrunc.f32 %v1983_v23  ;;  %v1584_v60 = vtrunc.f32 %v1904_v10 }
  0xe6   :  { %1460 = vmatmul.mubr.f32.vlgmr.msra.gmra.mxu1 %v1621_v62  ;;  %v1420_v0 = vpop.f32.mrf.mxu0  ;;  %v1597_v21 = vcvt.f32.s32 %v1596_v58  ;;  %v1594_v62 = vtrunc.f32 %v1946_v18  ;;  %v1590_v23 = vtrunc.f32 %v1932_v16  ;;  %v1586_v18 = vtrunc.f32 %v1912_v12  ;;  %v1296_v12 = vld [vmem:[%s2680_s4] ss:$0 sm:$0xff] }
  0xe7   :  { %1636 = vtanh.f32 %v225_v63  ;;  %v240_v1 = vadd.f32 %v1420_v0, %v1278_v41  ;;  %v1605_v61 = vcvt.f32.s32 %v1604_v59  ;;  %v1585_v63 = vcvt.f32.s32 %v1584_v60 }
  0xe8   :  { %v1623_v6 = vpop.eup %1622  ;;  %v234_v7 = vpop.f32.mrf.mxu0  ;;  %882 = vperm.xlu0 %1615, %v1601_v55   ;;  %v1575_v0 = vcvt.f32.s32 %v1574_v22  ;;  %v1595_v20 = vcvt.f32.s32 %v1594_v62  ;;  %v1591_v10 = vcvt.f32.s32 %v1590_v23  ;;  %v1578_v16 = vtrunc.f32 %v1872_v4 }
  0xe9   :  { %v1625_v9 = vpop.eup %1624  ;;  %1462 = vmatprep.mubr.f32.mxu1 %v1623_v6  ;;  %v235_v11 = vadd.f32 %v1278_v41, %v234_v7  ;;  %1638 = vtanh.f32 %v240_v1  ;;  %888 = vperm.xlu1 %1614, %v1605_v61   ;;  %v1592_v1 = vtrunc.f32 %v1941_v17  ;;  %v1589_v6 = vcvt.f32.s32 %v1588_v2  ;;  %v2045_v2 = vld [vmem:[%s2682_s6] ss:$0 sm:$0xff] }
  0xea   :  { %1463 = vmatmul.mubr.f32.gmra.mxu1 %v1625_v9  ;;  %v1423_v13 = vpop.f32.mrf.mxu0  ;;  %v1587_v7 = vcvt.f32.s32 %v1586_v18  ;;  %v1582_v9 = vtrunc.f32 %v1892_v8  ;;  %v2684_v23 = vlaneseq }
  0xeb   :  { %1640 = vtanh.f32 %v235_v11  ;;  %v250_v15 = vadd.f32 %v1423_v13, %v1278_v41  ;;  %v1593_v19 = vcvt.f32.s32 %v1592_v1  ;;  %v1580_v11 = vtrunc.f32 %v1881_v5 }
  0xec   :  { %v1627_v24 = vpop.eup %1626  ;;  %v244_v25 = vpop.f32.mrf.mxu0  ;;  %879 = vperm.xlu0 %1615, %v1599_v57   ;;  %v1583_v17 = vcvt.f32.s32 %v1582_v9 }
  0xed   :  { %v1629_v26 = vpop.eup %1628  ;;  %1465 = vmatprep.mubr.f32.mxu1 %v1627_v24  ;;  %v245_v27 = vadd.f32 %v1278_v41, %v244_v25  ;;  %1642 = vtanh.f32 %v250_v15  ;;  %858 = vperm.xlu1 %1614, %v1585_v63   ;;  %v1581_v13 = vcvt.f32.s32 %v1580_v11  ;;  %v1579_v15 = vcvt.f32.s32 %v1578_v16 }
  0xee   :  { %1466 = vmatmul.mubr.f32.gmra.mxu1 %v1629_v26  ;;  %v1426_v28 = vpop.f32.mrf.mxu0  ;;  %v1577_v24 = vcvt.f32.s32 %v1576_v14 }
  0xef   :  { %1644 = vtanh.f32 %v245_v27  ;;  %v260_v29 = vadd.f32 %v1426_v28, %v1278_v41 }
  0xf0   :  { %v1631_v30 = vpop.eup %1630  ;;  %v254_v31 = vpop.f32.mrf.mxu0  ;;  %876 = vperm.xlu0 %1615, %v1597_v21  }
  0xf1   :  { %v1633_v32 = vpop.eup %1632  ;;  %1468 = vmatprep.mubr.f32.mxu1 %v1631_v30  ;;  %v255_v33 = vadd.f32 %v1278_v41, %v254_v31  ;;  %1646 = vtanh.f32 %v260_v29  ;;  %v471_v41 = vld [vmem:[#allocation2 + $0x40] sm:$0xff]  ;;  %843 = vperm.xlu1 %1614, %v1575_v0  }
  0xf2   :  { %1469 = vmatmul.mubr.f32.gmra.mxu1 %v1633_v32  ;;  %v1635_v34 = vpop.eup %1634  ;;  %1497 = vmatprep.subr.mxu0 %v471_v41 }
  0xf3   :  { %1648 = vtanh.f32 %v255_v33  ;;  %1498 = vmatpush3.msra.mxu0 %v471_v41 }
  0xf4   :  { %v1637_v35 = vpop.eup %1636  ;;  %1499 = vmatprep.subr.mxu0 %v470_v43  ;;  %873 = vperm.xlu0 %1615, %v1595_v20  }
  0xf5   :  { %1471 = vmatprep.mubr.f32.mxu1 %v1637_v35  ;;  %1500 = vmatpush3.msra.mxu0 %v470_v43 }
  0xf6   :  { %1472 = vmatmul.mubr.f32.gmra.mxu1 %v1635_v34  ;;  %v1639_v36 = vpop.eup %1638  ;;  %1501 = vmatprep.subr.mxu0 %v469_v44 }
  0xf7   :  { %1502 = vmatpush3.msra.mxu0 %v469_v44 }
  0xf8   :  { %v1641_v37 = vpop.eup %1640  ;;  %1503 = vmatprep.subr.mxu0 %v468_v45  ;;  %870 = vperm.xlu0 %1615, %v1593_v19   ;;  %v1804_v19 = vmov 4  }
  0xf9   :  { %1474 = vmatprep.mubr.f32.mxu1 %v1641_v37  ;;  %1504 = vmatpush3.msra.mxu0 %v468_v45 }
  0xfa   :  { %1475 = vmatmul.mubr.f32.gmra.mxu1 %v1639_v36  ;;  %v1643_v38 = vpop.eup %1642  ;;  %1505 = vmatprep.subr.mxu0 %v467_v46 }
  0xfb   :  { %1506 = vmatpush3.msra.mxu0 %v467_v46  ;;  %1617 = vset.pattern.permute.xlu1 %v1804_v19 }
  0xfc   :  { %v1645_v39 = vpop.eup %1644  ;;  %1507 = vmatprep.subr.mxu0 %v466_v47  ;;  %867 = vperm.xlu0 %1615, %v1591_v10   ;;  %v2040_v10 = vand.u32 127, %v2684_v23 }
  0xfd   :  { %1477 = vmatprep.mubr.f32.mxu1 %v1645_v39  ;;  %1508 = vmatpush3.msra.mxu0 %v466_v47 }
  0xfe   :  { %1478 = vmatmul.mubr.f32.gmra.mxu1 %v1643_v38  ;;  %v1647_v40 = vpop.eup %1646  ;;  %1509 = vmatprep.subr.mxu0 %v465_v48  ;;  %vm633_vm2 = vcmp.lt.s32.totalorder %v2040_v10, 4  ;;  %vm1051_vm1 = vcmp.eq.s32.totalorder %v2040_v10, 1 }
  0xff   :  { %1510 = vmatpush3.msra.mxu0 %v465_v48 }
 0x100   :  { %v1649_v42 = vpop.eup %1648  ;;  %1511 = vmatprep.subr.mxu0 %v464_v49  ;;  %864 = vperm.xlu0 %1615, %v1589_v6  }
 0x101   :  { %1480 = vmatprep.mubr.f32.mxu1 %v1649_v42  ;;  %1512 = vmatpush3.msra.mxu0 %v464_v49 }
 0x102   :  { %1481 = vmatmul.mubr.f32.gmra.mxu1 %v1647_v40  ;;  %1513 = vmatprep.subr.mxu0 %v463_v50 }
 0x103   :  { %1514 = vmatpush3.msra.mxu0 %v463_v50 }
 0x104   :  { %861 = vperm.xlu0 %1615, %v1587_v7  }
 0x108   :  { %855 = vperm.xlu0 %1615, %v1583_v17  }
 0x10c   :  { %852 = vperm.xlu0 %1615, %v1581_v13  }
 0x110   :  { %849 = vperm.xlu0 %1615, %v1579_v15  }
 0x114   :  { %846 = vperm.xlu0 %1615, %v1577_v24  }
 0x118   :  { %1616 = vset.pattern.permute.xlu0 %v1804_v19 }
 0x1a6   :  { %v1461_v8 = vpop.f32.mrf.mxu1 }
 0x1a7   :  { %v374_v25 = vadd.f32 %v1461_v8, %v1296_v12 }
 0x1a8   :  { %v368_v26 = vpop.f32.mrf.mxu1 }
 0x1a9   :  { %v369_v27 = vadd.f32 %v1296_v12, %v368_v26 }
 0x1aa   :  { %v1464_v5 = vpop.f32.mrf.mxu1 }
 0x1ab   :  { %1650 = vtanh.f32 %v369_v27  ;;  %v384_v28 = vadd.f32 %v1464_v5, %v1296_v12 }
 0x1ac   :  { %1652 = vtanh.f32 %v374_v25  ;;  %v378_v4 = vpop.f32.mrf.mxu1 }
 0x1ad   :  { %v379_v29 = vadd.f32 %v1296_v12, %v378_v4 }
 0x1ae   :  { %v1467_v30 = vpop.f32.mrf.mxu1 }
 0x1af   :  { %1654 = vtanh.f32 %v379_v29  ;;  %v394_v3 = vadd.f32 %v1467_v30, %v1296_v12 }
 0x1b0   :  { %1656 = vtanh.f32 %v384_v28  ;;  %v388_v31 = vpop.f32.mrf.mxu1 }
 0x1b1   :  { %v389_v32 = vadd.f32 %v1296_v12, %v388_v31 }
 0x1b2   :  { %v1470_v33 = vpop.f32.mrf.mxu1 }
 0x1b3   :  { %1658 = vtanh.f32 %v389_v32  ;;  %v404_v34 = vadd.f32 %v1470_v33, %v1296_v12 }
 0x1b4   :  { %1660 = vtanh.f32 %v394_v3  ;;  %v398_v35 = vpop.f32.mrf.mxu1 }
 0x1b5   :  { %v399_v36 = vadd.f32 %v1296_v12, %v398_v35 }
 0x1b6   :  { %v1473_v37 = vpop.f32.mrf.mxu1 }
 0x1b7   :  { %1662 = vtanh.f32 %v399_v36  ;;  %v414_v38 = vadd.f32 %v1473_v37, %v1296_v12 }
 0x1b8   :  { %v1651_v39 = vpop.eup %1650  ;;  %1664 = vtanh.f32 %v404_v34  ;;  %v408_v40 = vpop.f32.mrf.mxu1 }
 0x1b9   :  { %v1653_v42 = vpop.eup %1652  ;;  %1515 = vmatprep.mubr.f32.mxu0 %v1651_v39  ;;  %v409_v41 = vadd.f32 %v1296_v12, %v408_v40  ;;  %1666 = vtanh.f32 %v414_v38 }
 0x1ba   :  { %1516 = vmatmul.mubr.f32.vlgmr.msra.gmra.mxu0 %v1653_v42  ;;  %v1476_v43 = vpop.f32.mrf.mxu1 }
 0x1bb   :  { %1668 = vtanh.f32 %v409_v41  ;;  %v424_v44 = vadd.f32 %v1476_v43, %v1296_v12 }
 0x1bc   :  { %v1655_v45 = vpop.eup %1654  ;;  %v418_v46 = vpop.f32.mrf.mxu1 }
 0x1bd   :  { %v1657_v47 = vpop.eup %1656  ;;  %1518 = vmatprep.mubr.f32.mxu0 %v1655_v45  ;;  %v419_v48 = vadd.f32 %v1296_v12, %v418_v46  ;;  %1670 = vtanh.f32 %v424_v44 }
 0x1be   :  { %1519 = vmatmul.mubr.f32.gmra.mxu0 %v1657_v47  ;;  %v1479_v49 = vpop.f32.mrf.mxu1 }
 0x1bf   :  { %1672 = vtanh.f32 %v419_v48  ;;  %v434_v50 = vadd.f32 %v1479_v49, %v1296_v12 }
 0x1c0   :  { %v1659_v51 = vpop.eup %1658  ;;  %v428_v52 = vpop.f32.mrf.mxu1 }
 0x1c1   :  { %v1661_v53 = vpop.eup %1660  ;;  %1521 = vmatprep.mubr.f32.mxu0 %v1659_v51  ;;  %v429_v54 = vadd.f32 %v1296_v12, %v428_v52  ;;  %1674 = vtanh.f32 %v434_v50 }
 0x1c2   :  { %1522 = vmatmul.mubr.f32.gmra.mxu0 %v1661_v53  ;;  %v1482_v55 = vpop.f32.mrf.mxu1 }
 0x1c3   :  { %1676 = vtanh.f32 %v429_v54  ;;  %v444_v56 = vadd.f32 %v1482_v55, %v1296_v12  ;;  %v2151_v54 = vpop.permute.xlu0 %885 }
 0x1c4   :  { %v1663_v57 = vpop.eup %1662  ;;  %v438_v58 = vpop.f32.mrf.mxu1  ;;  %vm904_vm0 = vcmp.eq.s32.totalorder %v2040_v10, %v2151_v54 }
 0x1c5   :  { %v1665_v59 = vpop.eup %1664  ;;  %1524 = vmatprep.mubr.f32.mxu0 %v1663_v57  ;;  %v439_v60 = vadd.f32 %v1296_v12, %v438_v58  ;;  %1678 = vtanh.f32 %v444_v56 }
 0x1c6   :  { %1525 = vmatmul.mubr.f32.gmra.mxu0 %v1665_v59  ;;  %v1667_v61 = vpop.eup %1666 }
 0x1c7   :  { %1680 = vtanh.f32 %v439_v60  ;;  %v2153_v55 = vpop.permute.xlu0 %882 }
 0x1c8   :  { %v1669_v22 = vpop.eup %1668  ;;  %vm903_vm11 = vcmp.eq.s32.totalorder %v2040_v10, %v2153_v55 }
 0x1c9   :  { %1527 = vmatprep.mubr.f32.mxu0 %v1669_v22 }
 0x1ca   :  { %1528 = vmatmul.mubr.f32.gmra.mxu0 %v1667_v61  ;;  %v1671_v21 = vpop.eup %1670 }
 0x1cb   :  { %v2155_v56 = vpop.permute.xlu0 %879 }
 0x1cc   :  { %v1673_v62 = vpop.eup %1672  ;;  %vm902_vm14 = vcmp.eq.s32.totalorder %v2040_v10, %v2155_v56 }
 0x1cd   :  { %1530 = vmatprep.mubr.f32.mxu0 %v1673_v62 }
 0x1ce   :  { %1531 = vmatmul.mubr.f32.gmra.mxu0 %v1671_v21  ;;  %v1675_v63 = vpop.eup %1674 }
 0x1cf   :  { %v2158_v57 = vpop.permute.xlu0 %876 }
 0x1d0   :  { %v1677_v0 = vpop.eup %1676  ;;  %vm901_vm10 = vcmp.eq.s32.totalorder %v2040_v10, %v2158_v57 }
 0x1d1   :  { %1533 = vmatprep.mubr.f32.mxu0 %v1677_v0 }
 0x1d2   :  { %1534 = vmatmul.mubr.f32.gmra.mxu0 %v1675_v63  ;;  %v1679_v20 = vpop.eup %1678  ;;  %v2175_v63 = vpop.permute.xlu1 %888 }
 0x1d3   :  { %v2161_v58 = vpop.permute.xlu0 %873  ;;  %vm905_vm15 = vcmp.eq.s32.totalorder %v2040_v10, %v2175_v63  ;;  %v1805_v63 = vmov 0.0  }
 0x1d4   :  { %v1681_v1 = vpop.eup %1680  ;;  %vm900_vm12 = vcmp.eq.s32.totalorder %v2040_v10, %v2161_v58  ;;  %1539 = vmatprep.subr.mxu1 %v1805_v63 }
 0x1d5   :  { %1536 = vmatprep.mubr.f32.mxu0 %v1681_v1 }
 0x1d6   :  { %1537 = vmatmul.mubr.f32.gmra.mxu0 %v1679_v20  ;;  %v2180_v19 = vpop.permute.xlu1 %858 }
 0x1d7   :  { %v2163_v59 = vpop.permute.xlu0 %870  ;;  %vm895_vm4 = vcmp.eq.s32.totalorder %v2040_v10, %v2180_v19 }
 0x1d8   :  { %vm899_vm8 = vcmp.eq.s32.totalorder %v2040_v10, %v2163_v59 }
 0x1db   :  { %v2165_v60 = vpop.permute.xlu0 %867 }
 0x1dc   :  { %vm898_vm9 = vcmp.eq.s32.totalorder %v2040_v10, %v2165_v60 }
 0x1df   :  { %v2167_v61 = vpop.permute.xlu0 %864 }
 0x1e0   :  { %vm897_vm6 = vcmp.eq.s32.totalorder %v2040_v10, %v2167_v61 }
 0x1e3   :  { %v2169_v22 = vpop.permute.xlu0 %861 }
 0x1e4   :  { %vm896_vm7 = vcmp.eq.s32.totalorder %v2040_v10, %v2169_v22 }
 0x1e7   :  { %v2171_v21 = vpop.permute.xlu0 %855 }
 0x1e8   :  { %vm894_vm5 = vcmp.eq.s32.totalorder %v2040_v10, %v2171_v21 }
 0x1eb   :  { %v2173_v62 = vpop.permute.xlu0 %852 }
 0x1ec   :  { %vm893_vm3 = vcmp.eq.s32.totalorder %v2040_v10, %v2173_v62 }
 0x1ef   :  { %v2177_v20 = vpop.permute.xlu0 %849 }
 0x1f0   :  { %vm892_vm13 = vcmp.eq.s32.totalorder %v2040_v10, %v2177_v20 }
 0x27a   :  { %v1517_v6 = vpop.f32.mrf.mxu0 }
 0x27b   :  { %v2049_v18 = vadd.f32 %v1517_v6, %v2045_v2 }
 0x27c   :  { %v552_v7 = vpop.f32.mrf.mxu0 }
 0x27d   :  { %v2052_v9 = vadd.f32 %v2045_v2, %v552_v7  ;;  %v2057_v17 = vsel %vm633_vm2, %v2049_v18, -1e+30  ;;  %v2187_v7 = vpop.permute.xlu0 %846 }
 0x27e   :  { %652 = vmax.xlane.f32.xlu0 %v2057_v17  ;;  %v1520_v11 = vpop.f32.mrf.mxu0 }
 0x27f   :  { %2688 = vst [vmem:[#allocation5_spill] sm:$0xff] %v2052_v9  ;;  %v2061_v13 = vadd.f32 %v1520_v11, %v2045_v2  ;;  %v2066_v16 = vsel %vm633_vm2, %v2052_v9, -1e+30  ;;  %v2190_v11 = vpop.permute.xlu1 %843 }
 0x280   :  { %v562_v15 = vpop.f32.mrf.mxu0  ;;  %650 = vmax.xlane.f32.xlu1 %v2066_v16 }
 0x281   :  { %v2070_v14 = vadd.f32 %v2045_v2, %v562_v15  ;;  %v2075_v24 = vsel %vm633_vm2, %v2061_v13, -1e+30 }
 0x282   :  { %656 = vmax.xlane.f32.xlu0 %v2075_v24  ;;  %v1523_v12 = vpop.f32.mrf.mxu0 }
 0x283   :  { %v2079_v8 = vadd.f32 %v1523_v12, %v2045_v2  ;;  %v2084_v25 = vsel %vm633_vm2, %v2070_v14, -1e+30 }
 0x284   :  { %v572_v26 = vpop.f32.mrf.mxu0  ;;  %654 = vmax.xlane.f32.xlu1 %v2084_v25 }
 0x285   :  { %v2088_v27 = vadd.f32 %v2045_v2, %v572_v26  ;;  %v2093_v5 = vsel %vm633_vm2, %v2079_v8, -1e+30 }
 0x286   :  { %660 = vmax.xlane.f32.xlu0 %v2093_v5  ;;  %v1526_v28 = vpop.f32.mrf.mxu0 }
 0x287   :  { %v2097_v4 = vadd.f32 %v1526_v28, %v2045_v2  ;;  %v2102_v29 = vsel %vm633_vm2, %v2088_v27, -1e+30 }
 0x288   :  { %v582_v30 = vpop.f32.mrf.mxu0  ;;  %658 = vmax.xlane.f32.xlu1 %v2102_v29 }
 0x289   :  { %v2106_v3 = vadd.f32 %v2045_v2, %v582_v30  ;;  %v2111_v31 = vsel %vm633_vm2, %v2097_v4, -1e+30 }
 0x28a   :  { %664 = vmax.xlane.f32.xlu0 %v2111_v31  ;;  %v1529_v32 = vpop.f32.mrf.mxu0 }
 0x28b   :  { %v2117_v33 = vsel %vm633_vm2, %v2106_v3, -1e+30  ;;  %v598_v51 = vadd.f32 %v1529_v32, %v2045_v2 }
 0x28c   :  { %662 = vmax.xlane.f32.xlu1 %v2117_v33  ;;  %v592_v34 = vpop.f32.mrf.mxu0 }
 0x28d   :  { %v593_v49 = vadd.f32 %v2045_v2, %v592_v34  ;;  %v643_v52 = vsel %vm633_vm2, %v598_v51, -1e+30 }
 0x28e   :  { %v1532_v35 = vpop.f32.mrf.mxu0 }
 0x28f   :  { %v608_v36 = vadd.f32 %v1532_v35, %v2045_v2  ;;  %v642_v53 = vsel %vm633_vm2, %v593_v49, -1e+30 }
 0x290   :  { %v602_v37 = vpop.f32.mrf.mxu0 }
 0x291   :  { %v603_v38 = vadd.f32 %v2045_v2, %v602_v37  ;;  %v2124_v39 = vsel %vm633_vm2, %v608_v36, -1e+30 }
 0x292   :  { %v1535_v40 = vpop.f32.mrf.mxu0 }
 0x293   :  { %v2128_v42 = vsel %vm633_vm2, %v603_v38, -1e+30  ;;  %v618_v41 = vadd.f32 %v1535_v40, %v2045_v2 }
 0x294   :  { %v612_v43 = vpop.f32.mrf.mxu0 }
 0x295   :  { %v613_v44 = vadd.f32 %v2045_v2, %v612_v43  ;;  %v2134_v45 = vsel %vm633_vm2, %v618_v41, -1e+30 }
 0x296   :  { %v1538_v46 = vpop.f32.mrf.mxu0 }
 0x297   :  { %v2138_v47 = vsel %vm633_vm2, %v613_v44, -1e+30  ;;  %v628_v48 = vadd.f32 %v1538_v46, %v2045_v2 }
 0x298   :  { %v622_v0 = vpop.f32.mrf.mxu0 }
 0x299   :  { %v2144_v50 = vsel %vm633_vm2, %v628_v48, -1e+30  ;;  %v623_v1 = vadd.f32 %v2045_v2, %v622_v0 }
 0x29b   :  { %v2185_v6 = vsel %vm633_vm2, %v623_v1, -1e+30  ;;  %vm1034_vm2 = vcmp.eq.s32.totalorder %v2040_v10, 0 }
 0x29d   :  { %1094 = vperm.xlu1 %1617, %v593_v49  }
 0x2a0   :  { %1099 = vperm.xlu0 %1616, %v598_v51  }
 0x2bf   :  { %668 = vmax.xlane.f32.xlu0 %v643_v52 }
 0x2c1   :  { %666 = vmax.xlane.f32.xlu1 %v642_v53 }
 0x2d2   :  { %1104 = vperm.xlu1 %1617, %v603_v38  }
 0x2d5   :  { %1109 = vperm.xlu0 %1616, %v608_v36  }
 0x2f4   :  { %672 = vmax.xlane.f32.xlu0 %v2124_v39 }
 0x2f6   :  { %670 = vmax.xlane.f32.xlu1 %v2128_v42 }
 0x307   :  { %1119 = vperm.xlu1 %1617, %v618_v41   ;;  %v653_v15 = vpop.xlane.xlu0 %652 }
 0x309   :  { %v651_v12 = vpop.xlane.xlu1 %650 }
 0x30a   :  { %1129 = vperm.xlu0 %1616, %v628_v48  }
 0x30b   :  { %v657_v26 = vpop.xlane.xlu0 %656 }
 0x30d   :  { %v655_v2 = vpop.xlane.xlu1 %654 }
 0x30f   :  { %v661_v28 = vpop.xlane.xlu0 %660 }
 0x311   :  { %v659_v30 = vpop.xlane.xlu1 %658 }
 0x313   :  { %v665_v32 = vpop.xlane.xlu0 %664 }
 0x315   :  { %v663_v34 = vpop.xlane.xlu1 %662 }
 0x319   :  { %v2196_v36 = vpop.permute.xlu1 %1094 }
 0x31b   :  { %v2194_v35 = vpop.permute.xlu0 %1099 }
 0x329   :  { %680 = vmax.xlane.f32.xlu0 %v2144_v50 }
 0x32b   :  { %676 = vmax.xlane.f32.xlu1 %v2134_v45 }
 0x32d   :  { %678 = vmax.xlane.f32.xlu0 %v2185_v6 }
 0x33c   :  { %1114 = vperm.xlu1 %1617, %v613_v44  }
 0x343   :  { %1089 = vperm.xlu0 %1616, %v2097_v4  }
 0x348   :  { %v669_v37 = vpop.xlane.xlu0 %668 }
 0x349   :  { %v2198_v38 = vsub.f32 %v643_v52, %v669_v37  ;;  %v2217_v52 = vsub.f32 %v2057_v17, %v653_v15  ;;  %v2222_v37 = vsub.f32 %v2066_v16, %v651_v12  ;;  %v2230_v17 = vsub.f32 %v2084_v25, %v655_v2 }
 0x34a   :  { %v667_v40 = vpop.xlane.xlu1 %666  ;;  %v2239_v12 = vsub.f32 %v2102_v29, %v659_v30 }
 0x34b   :  { %v716_v41 = vmul.f32 1.442695, %v2198_v38  ;;  %v2201_v43 = vsub.f32 %v642_v53, %v667_v40  ;;  %v700_v0 = vmul.f32 1.442695, %v2217_v52  ;;  %v2226_v40 = vsub.f32 %v2075_v24, %v657_v26 }
 0x34c   :  { %v706_v25 = vmul.f32 1.442695, %v2239_v12 }
 0x34d   :  { %1682 = vpow2.f32 %v716_v41  ;;  %v714_v44 = vmul.f32 1.442695, %v2201_v43  ;;  %v702_v41 = vmul.f32 1.442695, %v2230_v17 }
 0x34f   :  { %1684 = vpow2.f32 %v714_v44  ;;  %v2234_v44 = vsub.f32 %v2093_v5, %v661_v28  ;;  %v2249_v5 = vsub.f32 %v2111_v31, %v665_v32 }
 0x350   :  { %v2211_v48 = vpop.permute.xlu0 %1109 }
 0x351   :  { %v708_v24 = vmul.f32 1.442695, %v2234_v44  ;;  %v712_v29 = vmul.f32 1.442695, %v2249_v5 }
 0x35a   :  { %v2205_v46 = vpop.eup %1682 }
 0x35c   :  { %v2208_v4 = vpop.eup %1684 }
 0x360   :  { %674 = vmax.xlane.f32.xlu1 %v2138_v47 }
 0x362   :  { %748 = vadd.xlane.f32.xlu0 %v2205_v46 }
 0x366   :  { %746 = vadd.xlane.f32.xlu0 %v2208_v4 }
 0x371   :  { %1124 = vperm.xlu1 %1617, %v623_v1   ;;  %v698_v1 = vmul.f32 1.442695, %v2222_v37 }
 0x37d   :  { %v673_v49 = vpop.xlane.xlu0 %672 }
 0x37e   :  { %v2214_v51 = vsub.f32 %v2124_v39, %v673_v49  ;;  %v704_v39 = vmul.f32 1.442695, %v2226_v40  ;;  %v2259_v49 = vsub.f32 %v2117_v33, %v663_v34 }
 0x380   :  { %v720_v53 = vmul.f32 1.442695, %v2214_v51  ;;  %v710_v31 = vmul.f32 1.442695, %v2259_v49 }
 0x382   :  { %1686 = vpow2.f32 %v720_v53 }
 0x383   :  { %1688 = vpow2.f32 %v700_v0  ;;  %v2261_v0 = vpop.permute.xlu1 %1104 }
 0x384   :  { %1690 = vpow2.f32 %v698_v1  ;;  %2689 = vst [vmem:[#allocation6_spill] sm:$0xff] %v2261_v0 }
 0x385   :  { %1692 = vpow2.f32 %v704_v39  ;;  %v2270_v33 = vpop.permute.xlu0 %1129 }
 0x386   :  { %1694 = vpow2.f32 %v702_v41  ;;  %2690 = vst [vmem:[#allocation7_spill] sm:$0xff] %v2270_v33 }
 0x387   :  { %1696 = vpow2.f32 %v708_v24  ;;  %v671_v1 = vpop.xlane.xlu1 %670 }
 0x388   :  { %1698 = vpow2.f32 %v706_v25  ;;  %v2266_v41 = vsub.f32 %v2128_v42, %v671_v1 }
 0x389   :  { %1700 = vpow2.f32 %v712_v29 }
 0x38a   :  { %1702 = vpow2.f32 %v710_v31  ;;  %v718_v24 = vmul.f32 1.442695, %v2266_v41 }
 0x38c   :  { %1704 = vpow2.f32 %v718_v24 }
 0x38f   :  { %v1687_v15 = vpop.eup %1686 }
 0x390   :  { %752 = vadd.xlane.f32.xlu0 %v1687_v15  ;;  %v965_v16 = vmul.f32 %v1687_v15, %v2214_v51  ;;  %v2241_v26 = vpop.eup %1688 }
 0x391   :  { %v2245_v2 = vpop.eup %1690 }
 0x392   :  { %v2251_v28 = vpop.eup %1692 }
 0x393   :  { %v2255_v30 = vpop.eup %1694 }
 0x394   :  { %992 = vadd.xlane.f32.xlu0 %v965_v16  ;;  %v1697_v53 = vpop.eup %1696  ;;  %v2268_v16 = vpop.permute.xlu1 %1119 }
 0x395   :  { %732 = vadd.xlane.f32.xlu1 %v2241_v26  ;;  %v1699_v32 = vpop.eup %1698  ;;  %v959_v39 = vmul.f32 %v1697_v53, %v2234_v44 }
 0x396   :  { %v1701_v15 = vpop.eup %1700  ;;  %v958_v34 = vmul.f32 %v1699_v32, %v2239_v12 }
 0x397   :  { %v961_v1 = vmul.f32 %v1701_v15, %v2249_v5 }
 0x399   :  { %730 = vadd.xlane.f32.xlu1 %v2245_v2 }
 0x39d   :  { %736 = vadd.xlane.f32.xlu1 %v2251_v28 }
 0x3a1   :  { %734 = vadd.xlane.f32.xlu1 %v2255_v30 }
 0x3a5   :  { %740 = vadd.xlane.f32.xlu1 %v1697_v53 }
 0x3a9   :  { %738 = vadd.xlane.f32.xlu1 %v1699_v32 }
 0x3ad   :  { %980 = vadd.xlane.f32.xlu1 %v959_v39  ;;  %v1703_v39 = vpop.eup %1702 }
 0x3ae   :  { %v960_v23 = vmul.f32 %v1703_v39, %v2259_v49 }
 0x3b1   :  { %744 = vadd.xlane.f32.xlu1 %v1701_v15 }
 0x3b2   :  { %v681_v53 = vpop.xlane.xlu0 %680 }
 0x3b3   :  { %v2279_v42 = vsub.f32 %v2144_v50, %v681_v53  ;;  %v962_v50 = vmul.f32 %v2208_v4, %v2201_v43 }
 0x3b4   :  { %v677_v25 = vpop.xlane.xlu1 %676 }
 0x3b5   :  { %v2275_v29 = vsub.f32 %v2134_v45, %v677_v25  ;;  %978 = vadd.xlane.f32.xlu1 %v958_v34  ;;  %v728_v32 = vmul.f32 1.442695, %v2279_v42  ;;  %v963_v45 = vmul.f32 %v2205_v46, %v2198_v38  ;;  %v1705_v34 = vpop.eup %1704 }
 0x3b6   :  { %v964_v15 = vmul.f32 %v1705_v34, %v2266_v41 }
 0x3b7   :  { %v724_v31 = vmul.f32 1.442695, %v2275_v29 }
 0x3b8   :  { %v2289_v53 = vpop.permute.xlu1 %1114 }
 0x3b9   :  { %1706 = vpow2.f32 %v724_v31  ;;  %742 = vadd.xlane.f32.xlu1 %v1703_v39  ;;  %2691 = vst [vmem:[#allocation8_spill] sm:$0xff] %v2289_v53  ;;  %v679_v31 = vpop.xlane.xlu0 %678 }
 0x3ba   :  { %1708 = vpow2.f32 %v728_v32  ;;  %v2297_v4 = vsub.f32 %v2185_v6, %v679_v31 }
 0x3bd   :  { %984 = vadd.xlane.f32.xlu1 %v961_v1  ;;  %v726_v1 = vmul.f32 1.442695, %v2297_v4 }
 0x3be   :  { %v2304_v6 = vpop.permute.xlu0 %1089 }
 0x3c1   :  { %982 = vadd.xlane.f32.xlu1 %v960_v23 }
 0x3c5   :  { %988 = vadd.xlane.f32.xlu1 %v963_v45 }
 0x3c6   :  { %v1707_v24 = vpop.eup %1706 }
 0x3c7   :  { %756 = vadd.xlane.f32.xlu0 %v1707_v24  ;;  %v1709_v25 = vpop.eup %1708  ;;  %v967_v45 = vmul.f32 %v1707_v24, %v2275_v29 }
 0x3c9   :  { %986 = vadd.xlane.f32.xlu1 %v962_v50 }
 0x3cb   :  { %990 = vadd.xlane.f32.xlu0 %v964_v15 }
 0x3cd   :  { %750 = vadd.xlane.f32.xlu1 %v1705_v34 }
 0x3cf   :  { %760 = vadd.xlane.f32.xlu0 %v1709_v25 }
 0x3e5   :  { %1079 = vperm.xlu0 %1616, %v2079_v8   ;;  %v969_v8 = vmul.f32 %v1709_v25, %v2279_v42 }
 0x3e9   :  { %v675_v23 = vpop.xlane.xlu1 %674 }
 0x3ea   :  { %v2293_v46 = vsub.f32 %v2138_v47, %v675_v23 }
 0x3eb   :  { %v749_v15 = vpop.xlane.xlu0 %748 }
 0x3ec   :  { %v722_v39 = vmul.f32 1.442695, %v2293_v46 }
 0x3ed   :  { %v2307_v24 = vpop.permute.xlu1 %1124 }
 0x3ee   :  { %1710 = vpow2.f32 %v722_v39  ;;  %2692 = vst [vmem:[#allocation9_spill] sm:$0xff] %v2307_v24 }
 0x3ef   :  { %1712 = vpow2.f32 %v726_v1  ;;  %v747_v23 = vpop.xlane.xlu0 %746 }
 0x3fb   :  { %v1711_v32 = vpop.eup %1710 }
 0x3fc   :  { %754 = vadd.xlane.f32.xlu1 %v1711_v32  ;;  %v966_v47 = vmul.f32 %v1711_v32, %v2293_v46  ;;  %v1713_v34 = vpop.eup %1712 }
 0x3fd   :  { %v968_v50 = vmul.f32 %v1713_v34, %v2297_v4 }
 0x400   :  { %996 = vadd.xlane.f32.xlu1 %v967_v45 }
 0x404   :  { %1000 = vadd.xlane.f32.xlu0 %v969_v8  ;;  %994 = vadd.xlane.f32.xlu1 %v966_v47 }
 0x408   :  { %998 = vadd.xlane.f32.xlu0 %v968_v50  ;;  %758 = vadd.xlane.f32.xlu1 %v1713_v34 }
 0x419   :  { %v753_v31 = vpop.xlane.xlu0 %752  ;;  %1084 = vperm.xlu1 %1617, %v2106_v3  }
 0x41a   :  { %1714 = vlog2.f32 %v753_v31 }
 0x41b   :  { %1716 = vrcp.f32 %v753_v31 }
 0x41d   :  { %v993_v47 = vpop.xlane.xlu0 %992 }
 0x41e   :  { %v2309_v25 = vpop.xlane.xlu1 %732 }
 0x422   :  { %v2311_v39 = vpop.xlane.xlu1 %730 }
 0x426   :  { %v2313_v1 = vpop.xlane.xlu1 %736 }
 0x427   :  { %v1715_v32 = vpop.eup %1714  ;;  %1718 = vlog2.f32 %v2313_v1 }
 0x428   :  { %v1717_v45 = vpop.eup %1716  ;;  %v2316_v8 = vmul.f32 0.6931472, %v1715_v32 }
 0x429   :  { %v2318_v34 = vmul.f32 %v1717_v45, %v993_v47 }
 0x42a   :  { %v2320_v3 = vpop.xlane.xlu1 %734 }
 0x42b   :  { %2693 = vst [vmem:[#allocation10_spill] sm:$0xff] %v2318_v34 }
 0x42e   :  { %v741_v31 = vpop.xlane.xlu1 %740 }
 0x42f   :  { %1720 = vlog2.f32 %v741_v31 }
 0x430   :  { %1722 = vrcp.f32 %v741_v31  ;;  %v957_v31 = vmul.f32 %v2251_v28, %v2226_v40 }
 0x432   :  { %v739_v24 = vpop.xlane.xlu1 %738 }
 0x433   :  { %1724 = vlog2.f32 %v739_v24 }
 0x434   :  { %v1719_v33 = vpop.eup %1718  ;;  %1726 = vrcp.f32 %v739_v24 }
 0x435   :  { %v2324_v53 = vmul.f32 0.6931472, %v1719_v33 }
 0x436   :  { %v981_v9 = vpop.xlane.xlu1 %980 }
 0x437   :  { %2694 = vst [vmem:[#allocation11_spill] sm:$0xff] %v2324_v53  ;;  %v829_v32 = vsub.f32 %v2226_v40, %v2324_v53  ;;  %v956_v53 = vmul.f32 %v2255_v30, %v2230_v17 }
 0x439   :  { %v909_v45 = vsel %vm893_vm3, %v829_v32, 0.0  ;;  %vm1164_vm3 = vcmp.eq.s32.totalorder %v2040_v10, 2 }
 0x43a   :  { %928 = vadd.xlane.f32.xlu0 %v909_v45  ;;  %v745_v47 = vpop.xlane.xlu1 %744 }
 0x43b   :  { %1728 = vlog2.f32 %v745_v47 }
 0x43c   :  { %v1721_v50 = vpop.eup %1720  ;;  %1730 = vrcp.f32 %v745_v47 }
 0x43d   :  { %v1723_v0 = vpop.eup %1722  ;;  %v2332_v24 = vmul.f32 0.6931472, %v1721_v50  ;;  %976 = vadd.xlane.f32.xlu1 %v957_v31  ;;  %1732 = vlog2.f32 %v749_v15 }
 0x43e   :  { %v2334_v33 = vmul.f32 %v1723_v0, %v981_v9  ;;  %v979_v34 = vpop.xlane.xlu1 %978  ;;  %1734 = vrcp.f32 %v749_v15 }
 0x43f   :  { %v831_v62 = vsub.f32 %v2234_v44, %v2332_v24  ;;  %1736 = vlog2.f32 %v747_v23 }
 0x440   :  { %v1725_v32 = vpop.eup %1724 }
 0x441   :  { %v1727_v28 = vpop.eup %1726  ;;  %v2344_v50 = vmul.f32 0.6931472, %v1725_v32  ;;  %974 = vadd.xlane.f32.xlu1 %v956_v53  ;;  %v911_v9 = vsel %vm895_vm4, %v831_v62, 0.0  ;;  %vm891_vm4 = vcmp.eq.s32.totalorder %v2040_v10, %v2187_v7 }
 0x442   :  { %v2346_v0 = vmul.f32 %v1727_v28, %v979_v34  ;;  %932 = vadd.xlane.f32.xlu0 %v911_v9  ;;  %v743_v30 = vpop.xlane.xlu1 %742 }
 0x443   :  { %1738 = vlog2.f32 %v743_v30  ;;  %v830_v44 = vsub.f32 %v2239_v12, %v2344_v50 }
 0x444   :  { %1740 = vrcp.f32 %v743_v30 }
 0x445   :  { %1742 = vrcp.f32 %v747_v23  ;;  %v910_v15 = vsel %vm894_vm5, %v830_v44, 0.0  ;;  %vm890_vm5 = vcmp.eq.s32.totalorder %v2040_v10, %v2190_v11 }
 0x446   :  { %930 = vadd.xlane.f32.xlu0 %v910_v15  ;;  %v985_v53 = vpop.xlane.xlu1 %984 }
 0x448   :  { %v1729_v45 = vpop.eup %1728 }
 0x449   :  { %v1731_v34 = vpop.eup %1730  ;;  %v2354_v47 = vmul.f32 0.6931472, %v1729_v45 }
 0x44a   :  { %v2356_v31 = vmul.f32 %v1731_v34, %v985_v53  ;;  %v983_v62 = vpop.xlane.xlu1 %982  ;;  %v1733_v23 = vpop.eup %1732 }
 0x44b   :  { %v833_v12 = vsub.f32 %v2249_v5, %v2354_v47  ;;  %v1735_v28 = vpop.eup %1734  ;;  %v2368_v5 = vmul.f32 0.6931472, %v1733_v23 }
 0x44c   :  { %v1737_v30 = vpop.eup %1736 }
 0x44d   :  { %v913_v32 = vsel %vm897_vm6, %v833_v12, 0.0  ;;  %v2381_v23 = vmul.f32 0.6931472, %v1737_v30  ;;  %v837_v30 = vsub.f32 %v2214_v51, %v2316_v8  ;;  %vm1806_vm6 = vmmov 0  }
 0x44e   :  { %936 = vadd.xlane.f32.xlu0 %v913_v32  ;;  %v989_v9 = vpop.xlane.xlu1 %988  ;;  %1571 = vmatprep.mubr.msk.f32.mxu1 %vm1806_vm6, %v1805_v63 }
 0x44f   :  { %v2364_v44 = vmul.f32 %v1735_v28, %v989_v9  ;;  %v834_v22 = vsub.f32 %v2201_v43, %v2381_v23  ;;  %v917_v59 = vsel %vm901_vm10, %v837_v30, 0.0 }
 0x450   :  { %v1739_v15 = vpop.eup %1738  ;;  %v757_v53 = vpop.xlane.xlu0 %756 }
 0x451   :  { %v1741_v45 = vpop.eup %1740  ;;  %v2366_v34 = vmul.f32 0.6931472, %v1739_v15  ;;  %1744 = vlog2.f32 %v757_v53  ;;  %v914_v9 = vsel %vm898_vm9, %v834_v22, 0.0 }
 0x452   :  { %v1743_v61 = vpop.eup %1742  ;;  %v2370_v19 = vmul.f32 %v1741_v45, %v983_v62  ;;  %v987_v21 = vpop.xlane.xlu1 %986  ;;  %1746 = vlog2.f32 %v2320_v3  ;;  %v835_v62 = vsub.f32 %v2198_v38, %v2368_v5 }
 0x453   :  { %v2372_v40 = vmul.f32 %v1743_v61, %v987_v21  ;;  %v832_v12 = vsub.f32 %v2259_v49, %v2366_v34 }
 0x454   :  { %v1024_v32 = vsub.f32 %v2366_v34, %v2370_v19  ;;  %v915_v49 = vsel %vm899_vm8, %v835_v62, 0.0 }
 0x455   :  { %v912_v28 = vsel %vm896_vm7, %v832_v12, 0.0  ;;  %v991_v12 = vpop.xlane.xlu0 %990 }
 0x456   :  { %934 = vadd.xlane.f32.xlu0 %v912_v28  ;;  %v751_v21 = vpop.xlane.xlu1 %750 }
 0x457   :  { %1748 = vlog2.f32 %v751_v21 }
 0x458   :  { %1750 = vrcp.f32 %v751_v21 }
 0x459   :  { %1752 = vrcp.f32 %v757_v53 }
 0x45a   :  { %940 = vadd.xlane.f32.xlu0 %v915_v49 }
 0x45e   :  { %v1745_v38 = vpop.eup %1744  ;;  %938 = vadd.xlane.f32.xlu0 %v914_v9  ;;  %v761_v9 = vpop.xlane.xlu0 %760 }
 0x45f   :  { %v2393_v15 = vmul.f32 0.6931472, %v1745_v38  ;;  %v1747_v43 = vpop.eup %1746  ;;  %1754 = vlog2.f32 %v761_v9 }
 0x460   :  { %v2403_v62 = vmul.f32 0.6931472, %v1747_v43  ;;  %1756 = vrcp.f32 %v761_v9 }
 0x461   :  { %v839_v45 = vsub.f32 %v2275_v29, %v2393_v15 }
 0x462   :  { %944 = vadd.xlane.f32.xlu0 %v917_v59  ;;  %v828_v49 = vsub.f32 %v2230_v17, %v2403_v62  ;;  %v1080_v30 = vpop.permute.xlu0 %1079 }
 0x463   :  { %v919_v60 = vsel %vm903_vm11, %v839_v45, 0.0 }
 0x464   :  { %v1749_v61 = vpop.eup %1748  ;;  %948 = vadd.xlane.f32.xlu1 %v919_v60  ;;  %v908_v22 = vsel %vm892_vm13, %v828_v49, 0.0 }
 0x465   :  { %v1751_v51 = vpop.eup %1750  ;;  %v2401_v28 = vmul.f32 0.6931472, %v1749_v61 }
 0x466   :  { %v2405_v21 = vmul.f32 %v1751_v51, %v991_v12  ;;  %v1753_v58 = vpop.eup %1752 }
 0x467   :  { %v836_v57 = vsub.f32 %v2266_v41, %v2401_v28 }
 0x468   :  { %v1028_v55 = vsub.f32 %v2401_v28, %v2405_v21 }
 0x469   :  { %v916_v29 = vsel %vm900_vm12, %v836_v57, 0.0 }
 0x46a   :  { %942 = vadd.xlane.f32.xlu0 %v916_v29 }
 0x46c   :  { %v1755_v45 = vpop.eup %1754 }
 0x46d   :  { %v1757_v43 = vpop.eup %1756  ;;  %v2421_v61 = vmul.f32 0.6931472, %v1755_v45 }
 0x46e   :  { %926 = vadd.xlane.f32.xlu0 %v908_v22 }
 0x485   :  { %v755_v41 = vpop.xlane.xlu1 %754 }
 0x486   :  { %1758 = vlog2.f32 %v755_v41 }
 0x487   :  { %1760 = vrcp.f32 %v755_v41 }
 0x489   :  { %v997_v38 = vpop.xlane.xlu1 %996 }
 0x48a   :  { %v2417_v59 = vmul.f32 %v1753_v58, %v997_v38  ;;  %v841_v38 = vsub.f32 %v2279_v42, %v2421_v61 }
 0x48c   :  { %v1031_v17 = vsub.f32 %v2393_v15, %v2417_v59  ;;  %v921_v45 = vsel %vm905_vm15, %v841_v38, 0.0  ;;  %v1175_v15 = vsel %vm1164_vm3, %v1028_v55, 0.0 }
 0x48d   :  { %v1001_v20 = vpop.xlane.xlu0 %1000  ;;  %v995_v60 = vpop.xlane.xlu1 %994 }
 0x48e   :  { %v2423_v53 = vmul.f32 %v1757_v43, %v1001_v20 }
 0x490   :  { %v1033_v51 = vsub.f32 %v2421_v61, %v2423_v53 }
 0x491   :  { %v759_v12 = vpop.xlane.xlu1 %758 }
 0x492   :  { %1762 = vlog2.f32 %v759_v12 }
 0x493   :  { %v1759_v57 = vpop.eup %1758  ;;  %1764 = vrcp.f32 %v759_v12 }
 0x494   :  { %v1761_v29 = vpop.eup %1760  ;;  %v2427_v49 = vmul.f32 0.6931472, %v1759_v57  ;;  %1766 = vrcp.f32 %v2313_v1 }
 0x495   :  { %v2429_v22 = vmul.f32 %v1761_v29, %v995_v60  ;;  %v999_v60 = vpop.xlane.xlu0 %998  ;;  %1768 = vrcp.f32 %v2320_v3  ;;  %v1137_v3 = vsel %vm1051_vm1, %v1080_v30, 0.0 }
 0x496   :  { %v838_v9 = vsub.f32 %v2293_v46, %v2427_v49  ;;  %1770 = vlog2.f32 %v2309_v25 }
 0x497   :  { %v1030_v41 = vsub.f32 %v2427_v49, %v2429_v22  ;;  %1772 = vlog2.f32 %v2311_v39 }
 0x498   :  { %v918_v58 = vsel %vm902_vm14, %v838_v9, 0.0  ;;  %1774 = vrcp.f32 %v2309_v25 }
 0x499   :  { %946 = vadd.xlane.f32.xlu1 %v918_v58  ;;  %v1177_v28 = vsel %vm1164_vm3, %v1030_v41, 0.0  ;;  %1776 = vrcp.f32 %v2311_v39 }
 0x49d   :  { %952 = vadd.xlane.f32.xlu1 %v921_v45 }
 0x49f   :  { %v1763_v43 = vpop.eup %1762 }
 0x4a0   :  { %v1765_v20 = vpop.eup %1764  ;;  %v2441_v46 = vmul.f32 0.6931472, %v1763_v43 }
 0x4a1   :  { %v2443_v12 = vmul.f32 %v1765_v20, %v999_v60  ;;  %v1767_v54 = vpop.eup %1766  ;;  %v2695_v60 = vsub.f32 %v2332_v24, %v2334_v33 }
 0x4a2   :  { %v840_v56 = vsub.f32 %v2297_v4, %v2441_v46  ;;  %v2457_v4 = vpop.permute.xlu1 %1084  ;;  %v1769_v38 = vpop.eup %1768 }
 0x4a3   :  { %v1032_v42 = vsub.f32 %v2441_v46, %v2443_v12  ;;  %v1771_v20 = vpop.eup %1770 }
 0x4a4   :  { %v920_v57 = vsel %vm904_vm0, %v840_v56, 0.0  ;;  %v1170_v56 = vsel %vm1164_vm3, %v2695_v60, 0.0  ;;  %v1773_v30 = vpop.eup %1772 }
 0x4a5   :  { %950 = vadd.xlane.f32.xlu0 %v920_v57  ;;  %v2490_v33 = vmul.f32 0.6931472, %v1773_v30  ;;  %v1026_v30 = vsub.f32 %v2381_v23, %v2372_v40  ;;  %v1775_v34 = vpop.eup %1774 }
 0x4ae   :  { %1074 = vperm.xlu1 %1617, %v2088_v27  }
 0x4bb   :  { %1069 = vperm.xlu0 %1616, %v2061_v13  }
 0x4c3   :  { %v2460_v9 = vpop.xlane.xlu0 %928 }
 0x4c6   :  { %v977_v29 = vpop.xlane.xlu1 %976 }
 0x4c7   :  { %v2462_v58 = vmul.f32 %v1767_v54, %v977_v29  ;;  %v955_v54 = vmul.f32 %v2241_v26, %v2217_v52  ;;  %v2482_v29 = vmul.f32 0.6931472, %v1771_v20  ;;  %v1139_v26 = vsel %vm1051_vm1, %v2304_v6, 0.0 }
 0x4c9   :  { %v827_v24 = vsub.f32 %v2217_v52, %v2482_v29  ;;  %v2696_v52 = vsub.f32 %v2354_v47, %v2356_v31  ;;  %v1141_v47 = vsel %vm1051_vm1, %v2194_v35, 0.0 }
 0x4ca   :  { %v975_v27 = vpop.xlane.xlu1 %974 }
 0x4cb   :  { %v2466_v13 = vmul.f32 %v1769_v38, %v975_v27  ;;  %v933_v1 = vpop.xlane.xlu0 %932  ;;  %v954_v27 = vmul.f32 %v2245_v2, %v2222_v37  ;;  %v826_v2 = vsub.f32 %v2222_v37, %v2490_v33  ;;  %v1172_v20 = vsel %vm1164_vm3, %v2696_v52, 0.0 }
 0x4cc   :  { %v1040_v45 = vsel %vm1034_vm2, %v933_v1, 0.0 }
 0x4cd   :  { %v1153_v43 = vadd.f32 %v1137_v3, %v1040_v45  ;;  %v906_v6 = vsel %vm890_vm5, %v826_v2, 0.0  ;;  %v1020_v25 = vsub.f32 %v2403_v62, %v2466_v13 }
 0x4cf   :  { %v2478_v57 = vadd.f32 %v1170_v56, %v1153_v43  ;;  %v2484_v38 = vpop.xlane.xlu0 %930  ;;  %v907_v43 = vsel %vm891_vm4, %v827_v24, 0.0  ;;  %v1027_v56 = vsub.f32 %v2368_v5, %v2364_v44  ;;  %v1140_v44 = vsel %vm1051_vm1, %v2196_v36, 0.0 }
 0x4d0   :  { %v1039_v41 = vsel %vm1034_vm2, %v2484_v38, 0.0 }
 0x4d1   :  { %v1174_v11 = vsel %vm1164_vm3, %v1027_v56, 0.0 }
 0x4d2   :  { %972 = vadd.xlane.f32.xlu1 %v955_v54 }
 0x4d6   :  { %970 = vadd.xlane.f32.xlu1 %v954_v27 }
 0x4d7   :  { %v937_v1 = vpop.xlane.xlu0 %936 }
 0x4d8   :  { %v1042_v3 = vsel %vm1034_vm2, %v937_v1, 0.0  ;;  %v1173_v1 = vsel %vm1164_vm3, %v1026_v30, 0.0  ;;  %v2701_v30 = vld [vmem:[#allocation8_spill] sm:$0xff] }
 0x4d9   :  { %v1155_v45 = vadd.f32 %v1139_v26, %v1042_v3 }
 0x4da   :  { %924 = vadd.xlane.f32.xlu0 %v907_v43  ;;  %v2697_v43 = vld [vmem:[#allocation10_spill] sm:$0xff] }
 0x4db   :  { %v2506_v7 = vadd.f32 %v1172_v20, %v1155_v45  ;;  %v1145_v45 = vsel %vm1051_vm1, %v2268_v16, 0.0  ;;  %v2698_v2 = vsub.f32 %v2316_v8, %v2697_v43  ;;  %v2699_v16 = vld [vmem:[#allocation6_spill] sm:$0xff]  ;;  %v2704_v43 = vld [vmem:[#allocation9_spill] sm:$0xff] }
 0x4dc   :  { %v1142_v8 = vsel %vm1051_vm1, %v2699_v16, 0.0 }
 0x4dd   :  { %v1176_v52 = vsel %vm1164_vm3, %v2698_v2, 0.0  ;;  %v1146_v2 = vsel %vm1051_vm1, %v2704_v43, 0.0 }
 0x4de   :  { %922 = vadd.xlane.f32.xlu0 %v906_v6  ;;  %v1178_v6 = vsel %vm1164_vm3, %v1031_v17, 0.0 }
 0x4df   :  { %v2510_v60 = vpop.xlane.xlu0 %934 }
 0x4e3   :  { %v941_v37 = vpop.xlane.xlu0 %940 }
 0x4e4   :  { %v1044_v31 = vsel %vm1034_vm2, %v941_v37, 0.0 }
 0x4e5   :  { %v1157_v54 = vadd.f32 %v1141_v47, %v1044_v31  ;;  %v2700_v31 = vld [vmem:[#allocation5_spill] sm:$0xff] }
 0x4e7   :  { %v2523_v27 = vadd.f32 %v1174_v11, %v1157_v54  ;;  %v939_v24 = vpop.xlane.xlu0 %938  ;;  %1064 = vperm.xlu1 %1617, %v2070_v14   ;;  %v1143_v14 = vsel %vm1051_vm1, %v2211_v48, 0.0  ;;  %v1144_v11 = vsel %vm1051_vm1, %v2701_v30, 0.0 }
 0x4e8   :  { %v1043_v35 = vsel %vm1034_vm2, %v939_v24, 0.0 }
 0x4e9   :  { %v1156_v5 = vadd.f32 %v1140_v44, %v1043_v35  ;;  %v2702_v35 = vld [vmem:[#allocation7_spill] sm:$0xff] }
 0x4eb   :  { %v2533_v40 = vadd.f32 %v1173_v1, %v1156_v5  ;;  %v945_v23 = vpop.xlane.xlu0 %944  ;;  %1059 = vperm.xlu1 %1617, %v2049_v18   ;;  %v1147_v5 = vsel %vm1051_vm1, %v2702_v35, 0.0  ;;  %v2706_v35 = vlaneseq }
 0x4ec   :  { %v1046_v26 = vsel %vm1034_vm2, %v945_v23, 0.0 }
 0x4ed   :  { %v1159_v36 = vadd.f32 %v1143_v14, %v1046_v26  ;;  %v949_v3 = vpop.xlane.xlu1 %948  ;;  %v1180_v14 = vsel %vm1164_vm3, %v1033_v51, 0.0 }
 0x4ee   :  { %v1048_v18 = vsel %vm1034_vm2, %v949_v3, 0.0 }
 0x4ef   :  { %v1192_v20 = vadd.f32 %v1176_v52, %v1159_v36  ;;  %v1161_v48 = vadd.f32 %v1145_v45, %v1048_v18  ;;  %v2703_v45 = vsub.f32 %v2344_v50, %v2346_v0  ;;  %v1179_v50 = vsel %vm1164_vm3, %v1032_v42, 0.0  ;;  %v2705_v18 = vld [vmem:[#allocation11_spill] sm:$0xff] }
 0x4f0   :  { %v1041_v42 = vsel %vm1034_vm2, %v2510_v60, 0.0 }
 0x4f1   :  { %v1194_v56 = vadd.f32 %v1178_v6, %v1161_v48  ;;  %v1169_v61 = vsel %vm1164_vm3, %v2703_v45, 0.0  ;;  %v1021_v48 = vsub.f32 %v2705_v18, %v2462_v58 }
 0x4f3   :  { %v943_v37 = vpop.xlane.xlu0 %942  ;;  %v1168_v46 = vsel %vm1164_vm3, %v1021_v48, 0.0 }
 0x4f4   :  { %v1045_v47 = vsel %vm1034_vm2, %v943_v37, 0.0  ;;  %1054 = vperm.xlu0 %1616, %v2700_v31   ;;  %v1038_v37 = vsel %vm1034_vm2, %v2460_v9, 0.0  ;;  %v1138_v9 = vsel %vm1051_vm1, %v2457_v4, 0.0 }
 0x4f5   :  { %v1158_v54 = vadd.f32 %v1142_v8, %v1045_v47  ;;  %v1154_v58 = vadd.f32 %v1138_v9, %v1041_v42  ;;  %v1167_v47 = vsel %vm1164_vm3, %v1020_v25, 0.0 }
 0x4f7   :  { %v1191_v59 = vadd.f32 %v1175_v15, %v1158_v54  ;;  %v927_v49 = vpop.xlane.xlu0 %926  ;;  %v1777_v15 = vpop.eup %1776 }
 0x522   :  { %v947_v17 = vpop.xlane.xlu1 %946 }
 0x523   :  { %v1047_v24 = vsel %vm1034_vm2, %v947_v17, 0.0 }
 0x524   :  { %v1160_v44 = vadd.f32 %v1144_v11, %v1047_v24 }
 0x526   :  { %v1193_v21 = vadd.f32 %v1177_v28, %v1160_v44  ;;  %v953_v55 = vpop.xlane.xlu1 %952 }
 0x527   :  { %v1050_v1 = vsel %vm1034_vm2, %v953_v55, 0.0 }
 0x528   :  { %v1163_v23 = vadd.f32 %v1147_v5, %v1050_v1  ;;  %v1198_v5 = vshrl.u32 %v2706_v35, 7 }
 0x52a   :  { %v1196_v22 = vadd.f32 %v1180_v14, %v1163_v23  ;;  %v1075_v26 = vpop.permute.xlu1 %1074  ;;  %vm1199_vm7 = vcmp.eq.s32.totalorder %v1198_v5, %v2040_v10 }
 0x52b   :  { %v1136_v36 = vsel %vm1051_vm1, %v1075_v26, 0.0 }
 0x52c   :  { %v1152_v3 = vadd.f32 %v1136_v36, %v1039_v41  ;;  %1540 = vmatpush3.xpose.msra.mxu1 %v1196_v22 }
 0x52d   :  { %1541 = vmatprep.subr.mxu1 %v1805_v63 }
 0x52e   :  { %v1185_v53 = vadd.f32 %v1169_v61, %v1152_v3  ;;  %v951_v51 = vpop.xlane.xlu0 %950 }
 0x52f   :  { %v1049_v38 = vsel %vm1034_vm2, %v951_v51, 0.0 }
 0x530   :  { %v1162_v52 = vadd.f32 %v1146_v2, %v1049_v38 }
 0x532   :  { %v1195_v0 = vadd.f32 %v1179_v50, %v1162_v52 }
 0x534   :  { %1542 = vmatpush3.xpose.msra.mxu1 %v1195_v0 }
 0x535   :  { %1543 = vmatprep.subr.mxu1 %v1805_v63 }
 0x536   :  { %v1070_v6 = vpop.permute.xlu0 %1069 }
 0x537   :  { %v1135_v16 = vsel %vm1051_vm1, %v1070_v6, 0.0 }
 0x538   :  { %v1151_v8 = vadd.f32 %v1135_v16, %v1038_v37  ;;  %1544 = vmatpush3.xpose.msra.mxu1 %v1194_v56 }
 0x539   :  { %1545 = vmatprep.subr.mxu1 %v1805_v63 }
 0x53a   :  { %v1184_v12 = vadd.f32 %v1168_v46, %v1151_v8 }
 0x53c   :  { %1546 = vmatpush3.xpose.msra.mxu1 %v1193_v21 }
 0x53d   :  { %1547 = vmatprep.subr.mxu1 %v1805_v63 }
 0x540   :  { %1548 = vmatpush3.xpose.msra.mxu1 %v1192_v20 }
 0x541   :  { %1549 = vmatprep.subr.mxu1 %v1805_v63 }
 0x544   :  { %1550 = vmatpush3.xpose.msra.mxu1 %v1191_v59 }
 0x545   :  { %1551 = vmatprep.subr.mxu1 %v1805_v63 }
 0x548   :  { %1552 = vmatpush3.xpose.msra.mxu1 %v2523_v27  ;;  %v1171_v27 = vsel %vm1164_vm3, %v1024_v32, 0.0 }
 0x549   :  { %1553 = vmatprep.subr.mxu1 %v1805_v63  ;;  %v1187_v60 = vadd.f32 %v1171_v27, %v1154_v58 }
 0x54c   :  { %1554 = vmatpush3.xpose.msra.mxu1 %v2533_v40 }
 0x54d   :  { %1555 = vmatprep.subr.mxu1 %v1805_v63 }
 0x550   :  { %1556 = vmatpush3.xpose.msra.mxu1 %v2506_v7 }
 0x551   :  { %1557 = vmatprep.subr.mxu1 %v1805_v63 }
 0x554   :  { %1558 = vmatpush3.xpose.msra.mxu1 %v1187_v60 }
 0x555   :  { %1559 = vmatprep.subr.mxu1 %v1805_v63 }
 0x558   :  { %1560 = vmatpush3.xpose.msra.mxu1 %v2478_v57  ;;  %v1037_v57 = vsel %vm1034_vm2, %v927_v49, 0.0 }
 0x559   :  { %1561 = vmatprep.subr.mxu1 %v1805_v63 }
 0x55b   :  { %v973_v4 = vpop.xlane.xlu1 %972 }
 0x55c   :  { %1562 = vmatpush3.xpose.msra.mxu1 %v1185_v53  ;;  %v1003_v32 = vmul.f32 %v1775_v34, %v973_v4 }
 0x55d   :  { %1563 = vmatprep.subr.mxu1 %v1805_v63 }
 0x55e   :  { %v1019_v56 = vsub.f32 %v2482_v29, %v1003_v32 }
 0x55f   :  { %v971_v19 = vpop.xlane.xlu1 %970 }
 0x560   :  { %1564 = vmatpush3.xpose.msra.mxu1 %v1184_v12  ;;  %v1002_v17 = vmul.f32 %v1777_v15, %v971_v19  ;;  %v1166_v30 = vsel %vm1164_vm3, %v1019_v56, 0.0 }
 0x561   :  { %1565 = vmatprep.subr.mxu1 %v1805_v63 }
 0x562   :  { %v1018_v24 = vsub.f32 %v2490_v33, %v1002_v17  ;;  %v1807_v33 = vmov 1.0  }
 0x563   :  { %v1065_v7 = vpop.permute.xlu1 %1064  ;;  %v925_v39 = vpop.xlane.xlu0 %924 }
 0x564   :  { %v1134_v40 = vsel %vm1051_vm1, %v1065_v7, 0.0  ;;  %v1036_v62 = vsel %vm1034_vm2, %v925_v39, 0.0  ;;  %v1165_v1 = vsel %vm1164_vm3, %v1018_v24, 0.0 }
 0x565   :  { %v1150_v20 = vadd.f32 %v1134_v40, %v1037_v57 }
 0x567   :  { %v1183_v31 = vadd.f32 %v1167_v47, %v1150_v20  ;;  %v1060_v54 = vpop.permute.xlu1 %1059  ;;  %v923_v29 = vpop.xlane.xlu0 %922 }
 0x568   :  { %v1133_v13 = vsel %vm1051_vm1, %v1060_v54, 0.0  ;;  %v1035_v28 = vsel %vm1034_vm2, %v923_v29, 0.0 }
 0x569   :  { %v1149_v59 = vadd.f32 %v1133_v13, %v1036_v62  ;;  %1566 = vmatpush3.xpose.msra.mxu1 %v1183_v31 }
 0x56a   :  { %1567 = vmatprep.subr.mxu1 %v1805_v63 }
 0x56b   :  { %v1182_v11 = vadd.f32 %v1166_v30, %v1149_v59 }
 0x56d   :  { %1568 = vmatpush3.xpose.msra.mxu1 %v1182_v11 }
 0x56e   :  { %1569 = vmatprep.subr.mxu1 %v1805_v63 }
 0x56f   :  { %v1055_v44 = vpop.permute.xlu0 %1054 }
 0x570   :  { %v1132_v21 = vsel %vm1051_vm1, %v1055_v44, 0.0 }
 0x571   :  { %v1148_v55 = vadd.f32 %v1132_v21, %v1035_v28 }
 0x573   :  { %v1181_v23 = vadd.f32 %v1165_v1, %v1148_v55 }
 0x575   :  { %1570 = vmatpush3.xpose.msra.mxu1 %v1181_v23 }
 0x578   :  { %1572 = vmatmul.mubr.msk.f32.vlgmr.msra.gmra.mxu1 %vm1199_vm7, %v1807_v33 }
 0x638   :  { %v1268_v63 = vpop.f32.mrf.mxu1 }
 0x639   :  { %1272 = vst [vmem:[%s2683_s7] sm:$0xff] %v1268_v63 }
 0x63a   :  { %v1573_v14 = vpop.f32.mrf.mxu1 }
 0x63b   :  { %1277 = vsyncpa [#allocation3], 1 }

</bundles_post_ra>
